<compile_context>
chip_gen: v5e
topology: v5e:2x2
jax: 0.10.0
libtpu: 0.0.40
codegen_flags: <defaults>
</compile_context>

<pallas_src>
import jax
import jax.numpy as jnp
from jax.experimental import pallas as pl
from jax.experimental.pallas import tpu as pltpu


# ----------------------------------------------------------------------------
# Fully fused forward kernel (one grid step = one image)
# ----------------------------------------------------------------------------
def _make_fused_kernel(npp, wp, padl, pool_scale):
    # tap k = (kh, kw); shifted read offset in the padded-flattened spatial axis
    taps = [((k // 3) - 1) * wp + ((k % 3) - 1) for k in range(9)]

    def silu(y):
        return y * pl.reciprocal(1.0 + jnp.exp(-y), approx=True)

    def sigmoid_fast(y):
        return pl.reciprocal(1.0 + jnp.exp(-y), approx=True)

    def mm(w_ref, x):  # (Cout,Cin)@(Cin,N), bf16 operands, f32 accumulation
        return jnp.dot(w_ref[...], x.astype(jnp.bfloat16),
                       preferred_element_type=jnp.float32)

    def kernel(ps_ref, m_ref,
               stem_w, stem_b, fexp_w, fexp_b, fproj_w, fproj_b,
               mexp_w, mexp_b, mdw_w, mdw_b,
               ser_w, ser_b, see_w, see_b,
               mproj_w, mproj_b, head_w, head_b, cls_w, cls_b,
               o_ref, pad_a, pad_b):
        m = m_ref[...]                                     # (1, npp) interior mask

        # ---- stem conv3x3/s2 + SiLU (channel-folded bf16 patches, lane-dense)
        y0 = silu(mm(stem_w, ps_ref[...]) + stem_b[...])   # (C0, npp)
        y0m = y0 * m                                       # zero padded border cols

        # ---- Fused-MBConv expand: 3x3/s1 conv as 9 shifted MXU matmuls -------
        pad_a[...] = jnp.zeros_like(pad_a)
        pad_a[:, padl:padl + npp] = y0m
        acc = fexp_b[...]                                  # (Cf,1) bias folded into init
        for k, s in enumerate(taps):
            tap = pad_a[:, padl + s: padl + s + npp]       # (C0, npp)
            acc = acc + jnp.dot(fexp_w[k], tap.astype(jnp.bfloat16),
                                preferred_element_type=jnp.float32)
        y1 = silu(acc)                                     # (Cf, npp)

        # ---- 1x1 project with fused residual epilogue ------------------------
        x2 = mm(fproj_w, y1) + fproj_b[...] + y0m          # (C0, npp)

        # ---- MBConv expand 1x1 + SiLU ----------------------------------------
        y3 = silu(mm(mexp_w, x2) + mexp_b[...])            # (Cexp, npp)
        y3m = y3 * m

        # ---- depthwise 3x3 as 9 unrolled VPU FMAs + SiLU ---------------------
        pad_b[...] = jnp.zeros_like(pad_b)
        pad_b[:, padl:padl + npp] = y3m
        dww = mdw_w[...]                                   # (Cexp, 9), hoisted load
        dacc = mdw_b[...]                                  # (Cexp,1) bias folded into init
        for k, s in enumerate(taps):
            dacc = dacc + dww[:, k:k + 1] * pad_b[:, padl + s: padl + s + npp]
        y4 = silu(dacc)                                    # (Cexp, npp)

        # ---- fused Squeeze-Excite: pool -> FC -> FC -> channel gate ----------
        pool = jnp.sum(y4 * m, axis=1, keepdims=True) * pool_scale   # (Cexp, 1)
        s1 = silu(mm(ser_w, pool) + ser_b[...])                      # (Cse, 1)
        gate = sigmoid_fast(mm(see_w, s1) + see_b[...])              # (Cexp, 1)
        y5 = y4 * gate

        # ---- 1x1 project, head 1x1 + SiLU ------------------------------------
        y6 = mm(mproj_w, y5) + mproj_b[...]                # (C1, npp)
        y7 = silu(mm(head_w, y6) + head_b[...])            # (Chead, npp)

        # ---- global average pool + classifier + sigmoid (exact f32) ----------
        g = jnp.sum(y7 * m, axis=1, keepdims=True) * pool_scale      # (Chead, 1)
        logits = mm(cls_w, g) + cls_b[...]                 # (classes, 1)
        o_ref[...] = 1.0 / (1.0 + jnp.exp(-logits))

    return kernel


# ----------------------------------------------------------------------------
# Parameters (deterministic init; BN folded; matmul weights bf16, epilogues f32)
# ----------------------------------------------------------------------------
def init_params(key, classes_num=10):
    C0, Cf, Cexp, Cse, C1, Chead = 8, 16, 32, 8, 16, 32
    ks = jax.random.split(key, 16)

    def w(k, shape, fan_in, dtype=jnp.bfloat16):
        return (jax.random.normal(k, shape, jnp.float32) / jnp.sqrt(fan_in)).astype(dtype)

    def b(k, n):
        return 0.01 * jax.random.normal(k, (n, 1), jnp.float32)

    def z(n):
        return jnp.zeros((n, 1), jnp.float32)

    return dict(
        stem_w=w(ks[0], (C0, 27), 27), stem_b=b(ks[1], C0),
        f_exp_w=w(ks[2], (9, Cf, C0), 9 * C0), f_exp_b=b(ks[3], Cf),
        f_proj_w=w(ks[4], (C0, Cf), Cf), f_proj_b=b(ks[5], C0),
        m_exp_w=w(ks[6], (Cexp, C0), C0), m_exp_b=b(ks[7], Cexp),
        m_dw_w=w(ks[8], (Cexp, 9), 9, dtype=jnp.float32), m_dw_b=b(ks[9], Cexp),
        se_r_w=w(ks[10], (Cse, Cexp), Cexp), se_r_b=z(Cse),
        se_e_w=w(ks[11], (Cexp, Cse), Cse), se_e_b=z(Cexp),
        m_proj_w=w(ks[12], (C1, Cexp), Cexp), m_proj_b=b(ks[13], C1),
        head_w=w(ks[14], (Chead, C1), C1), head_b=z(Chead),
        cls_w=w(ks[15], (classes_num, Chead), Chead), cls_b=z(classes_num),
    )


# ----------------------------------------------------------------------------
# Forward pass (Cnn_Model.forward, eval mode, use_specaug=False)
# ----------------------------------------------------------------------------
@jax.jit
def cnn_model_forward(params, x_nchw):
    x = x_nchw.astype(jnp.float32)
    B, _, H, W = x.shape
    # torch's x.expand(B,3,H,W) makes 3 IDENTICAL channels; the stem conv is
    # linear, so fold the channel broadcast into the stem weight instead of
    # materializing it (exactly equivalent, 3x less patch traffic/compute).
    x2d = x[:, 0, :, :]                                   # (B, H, W)

    Ho = (H + 2 - 3) // 2 + 1
    Wo = (W + 2 - 3) // 2 + 1
    Hp, Wp = Ho + 2, Wo + 2
    npp = Hp * Wp                                         # padded-flattened spatial size

    # --- stem stride-2 patch extraction of the raw input (one-time glue) -----
    xp = jnp.pad(x2d, ((0, 0), (1, 1), (1, 1)))
    cols = []
    for kh in range(3):
        for kw in range(3):
            cols.append(xp[:, kh:kh + 2 * Ho:2, kw:kw + 2 * Wo:2][..., None])
    p = jnp.concatenate(cols, axis=-1)                    # (B, Ho, Wo, 9)
    pp = jnp.zeros((B, Hp, Wp, 9), jnp.float32)
    pp = pp.at[:, 1:1 + Ho, 1:1 + Wo, :].set(p)
    # (B, 9, npp), lane-dense, bf16 (matmul operand dtype anyway -> halves HBM read)
    pstem = pp.reshape(B, npp, 9).transpose(0, 2, 1).astype(jnp.bfloat16)

    mask = jnp.zeros((Hp, Wp), jnp.float32).at[1:1 + Ho, 1:1 + Wo].set(1.0)
    mask = mask.reshape(1, npp)

    # channel-fold stem weight: (C0, 27) -> (C0, 9)   [27 = 9 taps x 3 identical chans]
    stem_w27 = params["stem_w"].astype(jnp.float32)
    C0 = stem_w27.shape[0]
    stem_w9 = stem_w27.reshape(C0, 9, 3).sum(-1).astype(jnp.bfloat16)

    padl = max(16, Wp + 1)
    npad = ((npp + 2 * padl + 127) // 128) * 128          # one (or few) lane tiles

    weights = [stem_w9, params["stem_b"],
               params["f_exp_w"], params["f_exp_b"],
               params["f_proj_w"], params["f_proj_b"],
               params["m_exp_w"], params["m_exp_b"],
               params["m_dw_w"], params["m_dw_b"],
               params["se_r_w"], params["se_r_b"],
               params["se_e_w"], params["se_e_b"],
               params["m_proj_w"], params["m_proj_b"],
               params["head_w"], params["head_b"],
               params["cls_w"], params["cls_b"]]

    Cexp = params["m_exp_w"].shape[0]
    classes_num = params["cls_w"].shape[0]

    kernel = _make_fused_kernel(npp, Wp, padl, 1.0 / float(Ho * Wo))

    def _const_spec(shape):
        nd = len(shape)
        return pl.BlockSpec(shape, lambda b: (0,) * nd)

    in_specs = [
        pl.BlockSpec((None, 9, npp), lambda b: (b, 0, 0)),    # stem patches (per image)
        pl.BlockSpec((1, npp), lambda b: (0, 0)),             # interior mask
    ]
    in_specs += [_const_spec(wgt.shape) for wgt in weights]

    out = pl.pallas_call(
        kernel,
        out_shape=jax.ShapeDtypeStruct((B, classes_num, 1), jnp.float32),
        grid=(B,),
        in_specs=in_specs,
        out_specs=pl.BlockSpec((None, classes_num, 1), lambda b: (b, 0, 0)),
        scratch_shapes=[
            pltpu.VMEM((C0, npad), jnp.float32),    # zero-bordered buf for 3x3 expand conv
            pltpu.VMEM((Cexp, npad), jnp.float32),  # zero-bordered buf for depthwise conv
        ],
        compiler_params=pltpu.CompilerParams(
            dimension_semantics=("parallel",)),
    )(pstem, mask, *weights)

    return out[:, :, 0]                                    # (B, classes_num)


if __name__ == "__main__":
    key = jax.random.PRNGKey(0)
    k_param, k_x = jax.random.split(key)
    classes_num = 10
    params = init_params(k_param, classes_num=classes_num)

    # Input: (batch, 1, time_frames, mel_bins) spectrogram, matching the module's
    # x.expand(B, 3, H, W) usage.
    x = jax.random.normal(k_x, (2, 1, 16, 16), dtype=jnp.float32)

    out = cnn_model_forward(params, x)
    out = jax.block_until_ready(out)

    assert out.shape == (2, classes_num), out.shape
    assert bool(jnp.all((out >= 0.0) & (out <= 1.0))), "sigmoid output out of range"
    print("KERNEL_OK")
</pallas_src>

<mosaic_0001>
module attributes {stable_mosaic.version = 11 : i64} {
  func.func @kernel(%arg0: i32, %arg1: memref<1x9x100xbf16, #tpu.memory_space<vmem>>, %arg2: memref<1x100xf32, #tpu.memory_space<vmem>>, %arg3: memref<8x9xbf16, #tpu.memory_space<vmem>>, %arg4: memref<8x1xf32, #tpu.memory_space<vmem>>, %arg5: memref<9x16x8xbf16, #tpu.memory_space<vmem>>, %arg6: memref<16x1xf32, #tpu.memory_space<vmem>>, %arg7: memref<8x16xbf16, #tpu.memory_space<vmem>>, %arg8: memref<8x1xf32, #tpu.memory_space<vmem>>, %arg9: memref<32x8xbf16, #tpu.memory_space<vmem>>, %arg10: memref<32x1xf32, #tpu.memory_space<vmem>>, %arg11: memref<32x9xf32, #tpu.memory_space<vmem>>, %arg12: memref<32x1xf32, #tpu.memory_space<vmem>>, %arg13: memref<8x32xbf16, #tpu.memory_space<vmem>>, %arg14: memref<8x1xf32, #tpu.memory_space<vmem>>, %arg15: memref<32x8xbf16, #tpu.memory_space<vmem>>, %arg16: memref<32x1xf32, #tpu.memory_space<vmem>>, %arg17: memref<16x32xbf16, #tpu.memory_space<vmem>>, %arg18: memref<16x1xf32, #tpu.memory_space<vmem>>, %arg19: memref<32x16xbf16, #tpu.memory_space<vmem>>, %arg20: memref<32x1xf32, #tpu.memory_space<vmem>>, %arg21: memref<10x32xbf16, #tpu.memory_space<vmem>>, %arg22: memref<10x1xf32, #tpu.memory_space<vmem>>, %arg23: memref<1x10x1xf32, #tpu.memory_space<vmem>>, %arg24: memref<8x256xf32, #tpu.memory_space<vmem>>, %arg25: memref<32x256xf32, #tpu.memory_space<vmem>>) attributes {dimension_semantics = [#tpu.dimension_semantics<parallel>], iteration_bounds = array<i64: 2>, scalar_prefetch = 0 : i64, scratch_operands = 2 : i64, tpu.core_type = #tpu.core_type<tc>, window_params = [{transform_indices = @transform_0, window_bounds = array<i64: 1, 9, 100>}, {pipeline_mode = #tpu.pipeline_mode<synchronous>, transform_indices = @transform_1, window_bounds = array<i64: 1, 100>}, {pipeline_mode = #tpu.pipeline_mode<synchronous>, transform_indices = @transform_2, window_bounds = array<i64: 8, 9>}, {pipeline_mode = #tpu.pipeline_mode<synchronous>, transform_indices = @transform_3, window_bounds = array<i64: 8, 1>}, {pipeline_mode = #tpu.pipeline_mode<synchronous>, transform_indices = @transform_4, window_bounds = array<i64: 9, 16, 8>}, {pipeline_mode = #tpu.pipeline_mode<synchronous>, transform_indices = @transform_5, window_bounds = array<i64: 16, 1>}, {pipeline_mode = #tpu.pipeline_mode<synchronous>, transform_indices = @transform_6, window_bounds = array<i64: 8, 16>}, {pipeline_mode = #tpu.pipeline_mode<synchronous>, transform_indices = @transform_7, window_bounds = array<i64: 8, 1>}, {pipeline_mode = #tpu.pipeline_mode<synchronous>, transform_indices = @transform_8, window_bounds = array<i64: 32, 8>}, {pipeline_mode = #tpu.pipeline_mode<synchronous>, transform_indices = @transform_9, window_bounds = array<i64: 32, 1>}, {pipeline_mode = #tpu.pipeline_mode<synchronous>, transform_indices = @transform_10, window_bounds = array<i64: 32, 9>}, {pipeline_mode = #tpu.pipeline_mode<synchronous>, transform_indices = @transform_11, window_bounds = array<i64: 32, 1>}, {pipeline_mode = #tpu.pipeline_mode<synchronous>, transform_indices = @transform_12, window_bounds = array<i64: 8, 32>}, {pipeline_mode = #tpu.pipeline_mode<synchronous>, transform_indices = @transform_13, window_bounds = array<i64: 8, 1>}, {pipeline_mode = #tpu.pipeline_mode<synchronous>, transform_indices = @transform_14, window_bounds = array<i64: 32, 8>}, {pipeline_mode = #tpu.pipeline_mode<synchronous>, transform_indices = @transform_15, window_bounds = array<i64: 32, 1>}, {pipeline_mode = #tpu.pipeline_mode<synchronous>, transform_indices = @transform_16, window_bounds = array<i64: 16, 32>}, {pipeline_mode = #tpu.pipeline_mode<synchronous>, transform_indices = @transform_17, window_bounds = array<i64: 16, 1>}, {pipeline_mode = #tpu.pipeline_mode<synchronous>, transform_indices = @transform_18, window_bounds = array<i64: 32, 16>}, {pipeline_mode = #tpu.pipeline_mode<synchronous>, transform_indices = @transform_19, window_bounds = array<i64: 32, 1>}, {pipeline_mode = #tpu.pipeline_mode<synchronous>, transform_indices = @transform_20, window_bounds = array<i64: 10, 32>}, {pipeline_mode = #tpu.pipeline_mode<synchronous>, transform_indices = @transform_21, window_bounds = array<i64: 10, 1>}, {transform_indices = @transform_22, window_bounds = array<i64: 1, 10, 1>}]} {
    %c0 = arith.constant 0 : index
    %c0_0 = arith.constant 0 : index
    %0 = vector.load %arg2[%c0, %c0_0] : memref<1x100xf32, #tpu.memory_space<vmem>>, vector<1x100xf32>
    %c0_1 = arith.constant 0 : index
    %c0_2 = arith.constant 0 : index
    %c0_3 = arith.constant 0 : index
    %1 = vector.load %arg1[%c0_1, %c0_2, %c0_3] : memref<1x9x100xbf16, #tpu.memory_space<vmem>>, vector<1x9x100xbf16>
    %2 = vector.shape_cast %1 : vector<1x9x100xbf16> to vector<9x100xbf16>
    %c0_4 = arith.constant 0 : index
    %c0_5 = arith.constant 0 : index
    %3 = vector.load %arg3[%c0_4, %c0_5] : memref<8x9xbf16, #tpu.memory_space<vmem>>, vector<8x9xbf16>
    %cst = arith.constant dense<0.000000e+00> : vector<8x100xf32>
    %4 = tpu.matmul %3, %2, %cst {dimension_numbers = #tpu.dot_dimension_numbers<[1], [0], [0], [1], [0, 0, 1, 1], [], []>} : vector<8x9xbf16>, vector<9x100xbf16>, vector<8x100xf32> -> vector<8x100xf32>
    %c0_6 = arith.constant 0 : index
    %c0_7 = arith.constant 0 : index
    %5 = vector.load %arg4[%c0_6, %c0_7] : memref<8x1xf32, #tpu.memory_space<vmem>>, vector<8x1xf32>
    %6 = vector.broadcast %5 : vector<8x1xf32> to vector<8x100xf32>
    %7 = arith.addf %4, %6 : vector<8x100xf32>
    %cst_8 = arith.constant 0.000000e+00 : f32
    %8 = vector.broadcast %cst_8 : f32 to vector<8x100xf32>
    %9 = arith.subf %8, %7 : vector<8x100xf32>
    %10 = math.exp %9 : vector<8x100xf32>
    %cst_9 = arith.constant 1.000000e+00 : f32
    %11 = vector.broadcast %cst_9 : f32 to vector<8x100xf32>
    %12 = arith.addf %11, %10 : vector<8x100xf32>
    %13 = tpu.reciprocal %12 {approx = true} : vector<8x100xf32> -> vector<8x100xf32>
    %14 = arith.mulf %7, %13 : vector<8x100xf32>
    %15 = vector.broadcast %0 : vector<1x100xf32> to vector<8x100xf32>
    %16 = arith.mulf %14, %15 : vector<8x100xf32>
    %cst_10 = arith.constant 0.000000e+00 : f32
    %17 = vector.broadcast %cst_10 : f32 to vector<8x256xf32>
    %c0_11 = arith.constant 0 : index
    %c0_12 = arith.constant 0 : index
    %18 = vector.load %arg24[%c0_11, %c0_12] : memref<8x256xf32, #tpu.memory_space<vmem>>, vector<8x256xf32>
    tpu.vector_store %arg24[%c0_11, %c0_12], %17 {strides = array<i32>} : memref<8x256xf32, #tpu.memory_space<vmem>>, vector<8x256xf32>,
    %c0_13 = arith.constant 0 : index
    %c16 = arith.constant 16 : index
    %19 = vector.load %arg24[%c0_13, %c16] : memref<8x256xf32, #tpu.memory_space<vmem>>, vector<8x100xf32>
    tpu.vector_store %arg24[%c0_13, %c16], %16 {strides = array<i32>} : memref<8x256xf32, #tpu.memory_space<vmem>>, vector<8x100xf32>,
    %c0_14 = arith.constant 0 : index
    %c0_15 = arith.constant 0 : index
    %20 = vector.load %arg6[%c0_14, %c0_15] : memref<16x1xf32, #tpu.memory_space<vmem>>, vector<16x1xf32>
    %c0_16 = arith.constant 0 : index
    %c5 = arith.constant 5 : index
    %21 = vector.load %arg24[%c0_16, %c5] : memref<8x256xf32, #tpu.memory_space<vmem>>, vector<8x100xf32>
    %c0_17 = arith.constant 0 : index
    %c0_18 = arith.constant 0 : index
    %c0_19 = arith.constant 0 : index
    %22 = vector.load %arg5[%c0_17, %c0_18, %c0_19] : memref<9x16x8xbf16, #tpu.memory_space<vmem>>, vector<1x16x8xbf16>
    %23 = vector.shape_cast %22 : vector<1x16x8xbf16> to vector<16x8xbf16>
    %24 = arith.truncf %21 : vector<8x100xf32> to vector<8x100xbf16>
    %cst_20 = arith.constant dense<0.000000e+00> : vector<16x100xf32>
    %25 = tpu.matmul %23, %24, %cst_20 {dimension_numbers = #tpu.dot_dimension_numbers<[1], [0], [0], [1], [0, 0, 1, 1], [], []>} : vector<16x8xbf16>, vector<8x100xbf16>, vector<16x100xf32> -> vector<16x100xf32>
    %26 = vector.broadcast %20 : vector<16x1xf32> to vector<16x100xf32>
    %27 = arith.addf %26, %25 : vector<16x100xf32>
    %c0_21 = arith.constant 0 : index
    %c6 = arith.constant 6 : index
    %28 = vector.load %arg24[%c0_21, %c6] : memref<8x256xf32, #tpu.memory_space<vmem>>, vector<8x100xf32>
    %c1 = arith.constant 1 : index
    %c0_22 = arith.constant 0 : index
    %c0_23 = arith.constant 0 : index
    %29 = vector.load %arg5[%c1, %c0_22, %c0_23] : memref<9x16x8xbf16, #tpu.memory_space<vmem>>, vector<1x16x8xbf16>
    %30 = vector.shape_cast %29 : vector<1x16x8xbf16> to vector<16x8xbf16>
    %31 = arith.truncf %28 : vector<8x100xf32> to vector<8x100xbf16>
    %cst_24 = arith.constant dense<0.000000e+00> : vector<16x100xf32>
    %32 = tpu.matmul %30, %31, %cst_24 {dimension_numbers = #tpu.dot_dimension_numbers<[1], [0], [0], [1], [0, 0, 1, 1], [], []>} : vector<16x8xbf16>, vector<8x100xbf16>, vector<16x100xf32> -> vector<16x100xf32>
    %33 = arith.addf %27, %32 : vector<16x100xf32>
    %c0_25 = arith.constant 0 : index
    %c7 = arith.constant 7 : index
    %34 = vector.load %arg24[%c0_25, %c7] : memref<8x256xf32, #tpu.memory_space<vmem>>, vector<8x100xf32>
    %c2 = arith.constant 2 : index
    %c0_26 = arith.constant 0 : index
    %c0_27 = arith.constant 0 : index
    %35 = vector.load %arg5[%c2, %c0_26, %c0_27] : memref<9x16x8xbf16, #tpu.memory_space<vmem>>, vector<1x16x8xbf16>
    %36 = vector.shape_cast %35 : vector<1x16x8xbf16> to vector<16x8xbf16>
    %37 = arith.truncf %34 : vector<8x100xf32> to vector<8x100xbf16>
    %cst_28 = arith.constant dense<0.000000e+00> : vector<16x100xf32>
    %38 = tpu.matmul %36, %37, %cst_28 {dimension_numbers = #tpu.dot_dimension_numbers<[1], [0], [0], [1], [0, 0, 1, 1], [], []>} : vector<16x8xbf16>, vector<8x100xbf16>, vector<16x100xf32> -> vector<16x100xf32>
    %39 = arith.addf %33, %38 : vector<16x100xf32>
    %c0_29 = arith.constant 0 : index
    %c15 = arith.constant 15 : index
    %40 = vector.load %arg24[%c0_29, %c15] : memref<8x256xf32, #tpu.memory_space<vmem>>, vector<8x100xf32>
    %c3 = arith.constant 3 : index
    %c0_30 = arith.constant 0 : index
    %c0_31 = arith.constant 0 : index
    %41 = vector.load %arg5[%c3, %c0_30, %c0_31] : memref<9x16x8xbf16, #tpu.memory_space<vmem>>, vector<1x16x8xbf16>
    %42 = vector.shape_cast %41 : vector<1x16x8xbf16> to vector<16x8xbf16>
    %43 = arith.truncf %40 : vector<8x100xf32> to vector<8x100xbf16>
    %cst_32 = arith.constant dense<0.000000e+00> : vector<16x100xf32>
    %44 = tpu.matmul %42, %43, %cst_32 {dimension_numbers = #tpu.dot_dimension_numbers<[1], [0], [0], [1], [0, 0, 1, 1], [], []>} : vector<16x8xbf16>, vector<8x100xbf16>, vector<16x100xf32> -> vector<16x100xf32>
    %45 = arith.addf %39, %44 : vector<16x100xf32>
    %c0_33 = arith.constant 0 : index
    %c16_34 = arith.constant 16 : index
    %46 = vector.load %arg24[%c0_33, %c16_34] : memref<8x256xf32, #tpu.memory_space<vmem>>, vector<8x100xf32>
    %c4 = arith.constant 4 : index
    %c0_35 = arith.constant 0 : index
    %c0_36 = arith.constant 0 : index
    %47 = vector.load %arg5[%c4, %c0_35, %c0_36] : memref<9x16x8xbf16, #tpu.memory_space<vmem>>, vector<1x16x8xbf16>
    %48 = vector.shape_cast %47 : vector<1x16x8xbf16> to vector<16x8xbf16>
    %49 = arith.truncf %46 : vector<8x100xf32> to vector<8x100xbf16>
    %cst_37 = arith.constant dense<0.000000e+00> : vector<16x100xf32>
    %50 = tpu.matmul %48, %49, %cst_37 {dimension_numbers = #tpu.dot_dimension_numbers<[1], [0], [0], [1], [0, 0, 1, 1], [], []>} : vector<16x8xbf16>, vector<8x100xbf16>, vector<16x100xf32> -> vector<16x100xf32>
    %51 = arith.addf %45, %50 : vector<16x100xf32>
    %c0_38 = arith.constant 0 : index
    %c17 = arith.constant 17 : index
    %52 = vector.load %arg24[%c0_38, %c17] : memref<8x256xf32, #tpu.memory_space<vmem>>, vector<8x100xf32>
    %c5_39 = arith.constant 5 : index
    %c0_40 = arith.constant 0 : index
    %c0_41 = arith.constant 0 : index
    %53 = vector.load %arg5[%c5_39, %c0_40, %c0_41] : memref<9x16x8xbf16, #tpu.memory_space<vmem>>, vector<1x16x8xbf16>
    %54 = vector.shape_cast %53 : vector<1x16x8xbf16> to vector<16x8xbf16>
    %55 = arith.truncf %52 : vector<8x100xf32> to vector<8x100xbf16>
    %cst_42 = arith.constant dense<0.000000e+00> : vector<16x100xf32>
    %56 = tpu.matmul %54, %55, %cst_42 {dimension_numbers = #tpu.dot_dimension_numbers<[1], [0], [0], [1], [0, 0, 1, 1], [], []>} : vector<16x8xbf16>, vector<8x100xbf16>, vector<16x100xf32> -> vector<16x100xf32>
    %57 = arith.addf %51, %56 : vector<16x100xf32>
    %c0_43 = arith.constant 0 : index
    %c25 = arith.constant 25 : index
    %58 = vector.load %arg24[%c0_43, %c25] : memref<8x256xf32, #tpu.memory_space<vmem>>, vector<8x100xf32>
    %c6_44 = arith.constant 6 : index
    %c0_45 = arith.constant 0 : index
    %c0_46 = arith.constant 0 : index
    %59 = vector.load %arg5[%c6_44, %c0_45, %c0_46] : memref<9x16x8xbf16, #tpu.memory_space<vmem>>, vector<1x16x8xbf16>
    %60 = vector.shape_cast %59 : vector<1x16x8xbf16> to vector<16x8xbf16>
    %61 = arith.truncf %58 : vector<8x100xf32> to vector<8x100xbf16>
    %cst_47 = arith.constant dense<0.000000e+00> : vector<16x100xf32>
    %62 = tpu.matmul %60, %61, %cst_47 {dimension_numbers = #tpu.dot_dimension_numbers<[1], [0], [0], [1], [0, 0, 1, 1], [], []>} : vector<16x8xbf16>, vector<8x100xbf16>, vector<16x100xf32> -> vector<16x100xf32>
    %63 = arith.addf %57, %62 : vector<16x100xf32>
    %c0_48 = arith.constant 0 : index
    %c26 = arith.constant 26 : index
    %64 = vector.load %arg24[%c0_48, %c26] : memref<8x256xf32, #tpu.memory_space<vmem>>, vector<8x100xf32>
    %c7_49 = arith.constant 7 : index
    %c0_50 = arith.constant 0 : index
    %c0_51 = arith.constant 0 : index
    %65 = vector.load %arg5[%c7_49, %c0_50, %c0_51] : memref<9x16x8xbf16, #tpu.memory_space<vmem>>, vector<1x16x8xbf16>
    %66 = vector.shape_cast %65 : vector<1x16x8xbf16> to vector<16x8xbf16>
    %67 = arith.truncf %64 : vector<8x100xf32> to vector<8x100xbf16>
    %cst_52 = arith.constant dense<0.000000e+00> : vector<16x100xf32>
    %68 = tpu.matmul %66, %67, %cst_52 {dimension_numbers = #tpu.dot_dimension_numbers<[1], [0], [0], [1], [0, 0, 1, 1], [], []>} : vector<16x8xbf16>, vector<8x100xbf16>, vector<16x100xf32> -> vector<16x100xf32>
    %69 = arith.addf %63, %68 : vector<16x100xf32>
    %c0_53 = arith.constant 0 : index
    %c27 = arith.constant 27 : index
    %70 = vector.load %arg24[%c0_53, %c27] : memref<8x256xf32, #tpu.memory_space<vmem>>, vector<8x100xf32>
    %c8 = arith.constant 8 : index
    %c0_54 = arith.constant 0 : index
    %c0_55 = arith.constant 0 : index
    %71 = vector.load %arg5[%c8, %c0_54, %c0_55] : memref<9x16x8xbf16, #tpu.memory_space<vmem>>, vector<1x16x8xbf16>
    %72 = vector.shape_cast %71 : vector<1x16x8xbf16> to vector<16x8xbf16>
    %73 = arith.truncf %70 : vector<8x100xf32> to vector<8x100xbf16>
    %cst_56 = arith.constant dense<0.000000e+00> : vector<16x100xf32>
    %74 = tpu.matmul %72, %73, %cst_56 {dimension_numbers = #tpu.dot_dimension_numbers<[1], [0], [0], [1], [0, 0, 1, 1], [], []>} : vector<16x8xbf16>, vector<8x100xbf16>, vector<16x100xf32> -> vector<16x100xf32>
    %75 = arith.addf %69, %74 : vector<16x100xf32>
    %cst_57 = arith.constant 0.000000e+00 : f32
    %76 = vector.broadcast %cst_57 : f32 to vector<16x100xf32>
    %77 = arith.subf %76, %75 : vector<16x100xf32>
    %78 = math.exp %77 : vector<16x100xf32>
    %cst_58 = arith.constant 1.000000e+00 : f32
    %79 = vector.broadcast %cst_58 : f32 to vector<16x100xf32>
    %80 = arith.addf %79, %78 : vector<16x100xf32>
    %81 = tpu.reciprocal %80 {approx = true} : vector<16x100xf32> -> vector<16x100xf32>
    %82 = arith.mulf %75, %81 : vector<16x100xf32>
    %c0_59 = arith.constant 0 : index
    %c0_60 = arith.constant 0 : index
    %83 = vector.load %arg7[%c0_59, %c0_60] : memref<8x16xbf16, #tpu.memory_space<vmem>>, vector<8x16xbf16>
    %84 = arith.truncf %82 : vector<16x100xf32> to vector<16x100xbf16>
    %cst_61 = arith.constant dense<0.000000e+00> : vector<8x100xf32>
    %85 = tpu.matmul %83, %84, %cst_61 {dimension_numbers = #tpu.dot_dimension_numbers<[1], [0], [0], [1], [0, 0, 1, 1], [], []>} : vector<8x16xbf16>, vector<16x100xbf16>, vector<8x100xf32> -> vector<8x100xf32>
    %c0_62 = arith.constant 0 : index
    %c0_63 = arith.constant 0 : index
    %86 = vector.load %arg8[%c0_62, %c0_63] : memref<8x1xf32, #tpu.memory_space<vmem>>, vector<8x1xf32>
    %87 = vector.broadcast %86 : vector<8x1xf32> to vector<8x100xf32>
    %88 = arith.addf %85, %87 : vector<8x100xf32>
    %89 = arith.addf %88, %16 : vector<8x100xf32>
    %c0_64 = arith.constant 0 : index
    %c0_65 = arith.constant 0 : index
    %90 = vector.load %arg9[%c0_64, %c0_65] : memref<32x8xbf16, #tpu.memory_space<vmem>>, vector<32x8xbf16>
    %91 = arith.truncf %89 : vector<8x100xf32> to vector<8x100xbf16>
    %cst_66 = arith.constant dense<0.000000e+00> : vector<32x100xf32>
    %92 = tpu.matmul %90, %91, %cst_66 {dimension_numbers = #tpu.dot_dimension_numbers<[1], [0], [0], [1], [0, 0, 1, 1], [], []>} : vector<32x8xbf16>, vector<8x100xbf16>, vector<32x100xf32> -> vector<32x100xf32>
    %c0_67 = arith.constant 0 : index
    %c0_68 = arith.constant 0 : index
    %93 = vector.load %arg10[%c0_67, %c0_68] : memref<32x1xf32, #tpu.memory_space<vmem>>, vector<32x1xf32>
    %94 = vector.broadcast %93 : vector<32x1xf32> to vector<32x100xf32>
    %95 = arith.addf %92, %94 : vector<32x100xf32>
    %cst_69 = arith.constant 0.000000e+00 : f32
    %96 = vector.broadcast %cst_69 : f32 to vector<32x100xf32>
    %97 = arith.subf %96, %95 : vector<32x100xf32>
    %98 = math.exp %97 : vector<32x100xf32>
    %cst_70 = arith.constant 1.000000e+00 : f32
    %99 = vector.broadcast %cst_70 : f32 to vector<32x100xf32>
    %100 = arith.addf %99, %98 : vector<32x100xf32>
    %101 = tpu.reciprocal %100 {approx = true} : vector<32x100xf32> -> vector<32x100xf32>
    %102 = arith.mulf %95, %101 : vector<32x100xf32>
    %103 = vector.broadcast %0 : vector<1x100xf32> to vector<32x100xf32>
    %104 = arith.mulf %102, %103 : vector<32x100xf32>
    %cst_71 = arith.constant 0.000000e+00 : f32
    %105 = vector.broadcast %cst_71 : f32 to vector<32x256xf32>
    %c0_72 = arith.constant 0 : index
    %c0_73 = arith.constant 0 : index
    %106 = vector.load %arg25[%c0_72, %c0_73] : memref<32x256xf32, #tpu.memory_space<vmem>>, vector<32x256xf32>
    tpu.vector_store %arg25[%c0_72, %c0_73], %105 {strides = array<i32>} : memref<32x256xf32, #tpu.memory_space<vmem>>, vector<32x256xf32>,
    %c0_74 = arith.constant 0 : index
    %c16_75 = arith.constant 16 : index
    %107 = vector.load %arg25[%c0_74, %c16_75] : memref<32x256xf32, #tpu.memory_space<vmem>>, vector<32x100xf32>
    tpu.vector_store %arg25[%c0_74, %c16_75], %104 {strides = array<i32>} : memref<32x256xf32, #tpu.memory_space<vmem>>, vector<32x100xf32>,
    %c0_76 = arith.constant 0 : index
    %c0_77 = arith.constant 0 : index
    %108 = vector.load %arg11[%c0_76, %c0_77] : memref<32x9xf32, #tpu.memory_space<vmem>>, vector<32x9xf32>
    %c0_78 = arith.constant 0 : index
    %c0_79 = arith.constant 0 : index
    %109 = vector.load %arg12[%c0_78, %c0_79] : memref<32x1xf32, #tpu.memory_space<vmem>>, vector<32x1xf32>
    %110 = vector.extract_strided_slice %108 {offsets = [0, 0], sizes = [32, 1], strides = [1, 1]} : vector<32x9xf32> to vector<32x1xf32>
    %c0_80 = arith.constant 0 : index
    %c5_81 = arith.constant 5 : index
    %111 = vector.load %arg25[%c0_80, %c5_81] : memref<32x256xf32, #tpu.memory_space<vmem>>, vector<32x100xf32>
    %112 = vector.broadcast %110 : vector<32x1xf32> to vector<32x100xf32>
    %113 = arith.mulf %112, %111 : vector<32x100xf32>
    %114 = vector.broadcast %109 : vector<32x1xf32> to vector<32x100xf32>
    %115 = arith.addf %114, %113 : vector<32x100xf32>
    %116 = vector.extract_strided_slice %108 {offsets = [0, 1], sizes = [32, 1], strides = [1, 1]} : vector<32x9xf32> to vector<32x1xf32>
    %c0_82 = arith.constant 0 : index
    %c6_83 = arith.constant 6 : index
    %117 = vector.load %arg25[%c0_82, %c6_83] : memref<32x256xf32, #tpu.memory_space<vmem>>, vector<32x100xf32>
    %118 = vector.broadcast %116 : vector<32x1xf32> to vector<32x100xf32>
    %119 = arith.mulf %118, %117 : vector<32x100xf32>
    %120 = arith.addf %115, %119 : vector<32x100xf32>
    %121 = vector.extract_strided_slice %108 {offsets = [0, 2], sizes = [32, 1], strides = [1, 1]} : vector<32x9xf32> to vector<32x1xf32>
    %c0_84 = arith.constant 0 : index
    %c7_85 = arith.constant 7 : index
    %122 = vector.load %arg25[%c0_84, %c7_85] : memref<32x256xf32, #tpu.memory_space<vmem>>, vector<32x100xf32>
    %123 = vector.broadcast %121 : vector<32x1xf32> to vector<32x100xf32>
    %124 = arith.mulf %123, %122 : vector<32x100xf32>
    %125 = arith.addf %120, %124 : vector<32x100xf32>
    %126 = vector.extract_strided_slice %108 {offsets = [0, 3], sizes = [32, 1], strides = [1, 1]} : vector<32x9xf32> to vector<32x1xf32>
    %c0_86 = arith.constant 0 : index
    %c15_87 = arith.constant 15 : index
    %127 = vector.load %arg25[%c0_86, %c15_87] : memref<32x256xf32, #tpu.memory_space<vmem>>, vector<32x100xf32>
    %128 = vector.broadcast %126 : vector<32x1xf32> to vector<32x100xf32>
    %129 = arith.mulf %128, %127 : vector<32x100xf32>
    %130 = arith.addf %125, %129 : vector<32x100xf32>
    %131 = vector.extract_strided_slice %108 {offsets = [0, 4], sizes = [32, 1], strides = [1, 1]} : vector<32x9xf32> to vector<32x1xf32>
    %c0_88 = arith.constant 0 : index
    %c16_89 = arith.constant 16 : index
    %132 = vector.load %arg25[%c0_88, %c16_89] : memref<32x256xf32, #tpu.memory_space<vmem>>, vector<32x100xf32>
    %133 = vector.broadcast %131 : vector<32x1xf32> to vector<32x100xf32>
    %134 = arith.mulf %133, %132 : vector<32x100xf32>
    %135 = arith.addf %130, %134 : vector<32x100xf32>
    %136 = vector.extract_strided_slice %108 {offsets = [0, 5], sizes = [32, 1], strides = [1, 1]} : vector<32x9xf32> to vector<32x1xf32>
    %c0_90 = arith.constant 0 : index
    %c17_91 = arith.constant 17 : index
    %137 = vector.load %arg25[%c0_90, %c17_91] : memref<32x256xf32, #tpu.memory_space<vmem>>, vector<32x100xf32>
    %138 = vector.broadcast %136 : vector<32x1xf32> to vector<32x100xf32>
    %139 = arith.mulf %138, %137 : vector<32x100xf32>
    %140 = arith.addf %135, %139 : vector<32x100xf32>
    %141 = vector.extract_strided_slice %108 {offsets = [0, 6], sizes = [32, 1], strides = [1, 1]} : vector<32x9xf32> to vector<32x1xf32>
    %c0_92 = arith.constant 0 : index
    %c25_93 = arith.constant 25 : index
    %142 = vector.load %arg25[%c0_92, %c25_93] : memref<32x256xf32, #tpu.memory_space<vmem>>, vector<32x100xf32>
    %143 = vector.broadcast %141 : vector<32x1xf32> to vector<32x100xf32>
    %144 = arith.mulf %143, %142 : vector<32x100xf32>
    %145 = arith.addf %140, %144 : vector<32x100xf32>
    %146 = vector.extract_strided_slice %108 {offsets = [0, 7], sizes = [32, 1], strides = [1, 1]} : vector<32x9xf32> to vector<32x1xf32>
    %c0_94 = arith.constant 0 : index
    %c26_95 = arith.constant 26 : index
    %147 = vector.load %arg25[%c0_94, %c26_95] : memref<32x256xf32, #tpu.memory_space<vmem>>, vector<32x100xf32>
    %148 = vector.broadcast %146 : vector<32x1xf32> to vector<32x100xf32>
    %149 = arith.mulf %148, %147 : vector<32x100xf32>
    %150 = arith.addf %145, %149 : vector<32x100xf32>
    %151 = vector.extract_strided_slice %108 {offsets = [0, 8], sizes = [32, 1], strides = [1, 1]} : vector<32x9xf32> to vector<32x1xf32>
    %c0_96 = arith.constant 0 : index
    %c27_97 = arith.constant 27 : index
    %152 = vector.load %arg25[%c0_96, %c27_97] : memref<32x256xf32, #tpu.memory_space<vmem>>, vector<32x100xf32>
    %153 = vector.broadcast %151 : vector<32x1xf32> to vector<32x100xf32>
    %154 = arith.mulf %153, %152 : vector<32x100xf32>
    %155 = arith.addf %150, %154 : vector<32x100xf32>
    %cst_98 = arith.constant 0.000000e+00 : f32
    %156 = vector.broadcast %cst_98 : f32 to vector<32x100xf32>
    %157 = arith.subf %156, %155 : vector<32x100xf32>
    %158 = math.exp %157 : vector<32x100xf32>
    %cst_99 = arith.constant 1.000000e+00 : f32
    %159 = vector.broadcast %cst_99 : f32 to vector<32x100xf32>
    %160 = arith.addf %159, %158 : vector<32x100xf32>
    %161 = tpu.reciprocal %160 {approx = true} : vector<32x100xf32> -> vector<32x100xf32>
    %162 = arith.mulf %155, %161 : vector<32x100xf32>
    %163 = vector.broadcast %0 : vector<1x100xf32> to vector<32x100xf32>
    %164 = arith.mulf %162, %163 : vector<32x100xf32>
    %cst_100 = arith.constant dense<0.000000e+00> : vector<32xf32>
    %165 = vector.multi_reduction <add>, %164, %cst_100 [1] : vector<32x100xf32> to vector<32xf32>
    %166 = vector.shape_cast %165 : vector<32xf32> to vector<32x1xf32>
    %cst_101 = arith.constant 1.562500e-02 : f32
    %167 = vector.broadcast %cst_101 : f32 to vector<32x1xf32>
    %168 = arith.mulf %166, %167 : vector<32x1xf32>
    %c0_102 = arith.constant 0 : index
    %c0_103 = arith.constant 0 : index
    %169 = vector.load %arg13[%c0_102, %c0_103] : memref<8x32xbf16, #tpu.memory_space<vmem>>, vector<8x32xbf16>
    %170 = arith.truncf %168 : vector<32x1xf32> to vector<32x1xbf16>
    %cst_104 = arith.constant dense<0.000000e+00> : vector<8x1xf32>
    %171 = tpu.matmul %169, %170, %cst_104 {dimension_numbers = #tpu.dot_dimension_numbers<[1], [0], [0], [1], [0, 0, 1, 1], [], []>} : vector<8x32xbf16>, vector<32x1xbf16>, vector<8x1xf32> -> vector<8x1xf32>
    %c0_105 = arith.constant 0 : index
    %c0_106 = arith.constant 0 : index
    %172 = vector.load %arg14[%c0_105, %c0_106] : memref<8x1xf32, #tpu.memory_space<vmem>>, vector<8x1xf32>
    %173 = arith.addf %171, %172 : vector<8x1xf32>
    %cst_107 = arith.constant 0.000000e+00 : f32
    %174 = vector.broadcast %cst_107 : f32 to vector<8x1xf32>
    %175 = arith.subf %174, %173 : vector<8x1xf32>
    %176 = math.exp %175 : vector<8x1xf32>
    %cst_108 = arith.constant 1.000000e+00 : f32
    %177 = vector.broadcast %cst_108 : f32 to vector<8x1xf32>
    %178 = arith.addf %177, %176 : vector<8x1xf32>
    %179 = tpu.reciprocal %178 {approx = true} : vector<8x1xf32> -> vector<8x1xf32>
    %180 = arith.mulf %173, %179 : vector<8x1xf32>
    %c0_109 = arith.constant 0 : index
    %c0_110 = arith.constant 0 : index
    %181 = vector.load %arg15[%c0_109, %c0_110] : memref<32x8xbf16, #tpu.memory_space<vmem>>, vector<32x8xbf16>
    %182 = arith.truncf %180 : vector<8x1xf32> to vector<8x1xbf16>
    %cst_111 = arith.constant dense<0.000000e+00> : vector<32x1xf32>
    %183 = tpu.matmul %181, %182, %cst_111 {dimension_numbers = #tpu.dot_dimension_numbers<[1], [0], [0], [1], [0, 0, 1, 1], [], []>} : vector<32x8xbf16>, vector<8x1xbf16>, vector<32x1xf32> -> vector<32x1xf32>
    %c0_112 = arith.constant 0 : index
    %c0_113 = arith.constant 0 : index
    %184 = vector.load %arg16[%c0_112, %c0_113] : memref<32x1xf32, #tpu.memory_space<vmem>>, vector<32x1xf32>
    %185 = arith.addf %183, %184 : vector<32x1xf32>
    %cst_114 = arith.constant 0.000000e+00 : f32
    %186 = vector.broadcast %cst_114 : f32 to vector<32x1xf32>
    %187 = arith.subf %186, %185 : vector<32x1xf32>
    %188 = math.exp %187 : vector<32x1xf32>
    %cst_115 = arith.constant 1.000000e+00 : f32
    %189 = vector.broadcast %cst_115 : f32 to vector<32x1xf32>
    %190 = arith.addf %189, %188 : vector<32x1xf32>
    %191 = tpu.reciprocal %190 {approx = true} : vector<32x1xf32> -> vector<32x1xf32>
    %192 = vector.broadcast %191 : vector<32x1xf32> to vector<32x100xf32>
    %193 = arith.mulf %162, %192 : vector<32x100xf32>
    %c0_116 = arith.constant 0 : index
    %c0_117 = arith.constant 0 : index
    %194 = vector.load %arg17[%c0_116, %c0_117] : memref<16x32xbf16, #tpu.memory_space<vmem>>, vector<16x32xbf16>
    %195 = arith.truncf %193 : vector<32x100xf32> to vector<32x100xbf16>
    %cst_118 = arith.constant dense<0.000000e+00> : vector<16x100xf32>
    %196 = tpu.matmul %194, %195, %cst_118 {dimension_numbers = #tpu.dot_dimension_numbers<[1], [0], [0], [1], [0, 0, 1, 1], [], []>} : vector<16x32xbf16>, vector<32x100xbf16>, vector<16x100xf32> -> vector<16x100xf32>
    %c0_119 = arith.constant 0 : index
    %c0_120 = arith.constant 0 : index
    %197 = vector.load %arg18[%c0_119, %c0_120] : memref<16x1xf32, #tpu.memory_space<vmem>>, vector<16x1xf32>
    %198 = vector.broadcast %197 : vector<16x1xf32> to vector<16x100xf32>
    %199 = arith.addf %196, %198 : vector<16x100xf32>
    %c0_121 = arith.constant 0 : index
    %c0_122 = arith.constant 0 : index
    %200 = vector.load %arg19[%c0_121, %c0_122] : memref<32x16xbf16, #tpu.memory_space<vmem>>, vector<32x16xbf16>
    %201 = arith.truncf %199 : vector<16x100xf32> to vector<16x100xbf16>
    %cst_123 = arith.constant dense<0.000000e+00> : vector<32x100xf32>
    %202 = tpu.matmul %200, %201, %cst_123 {dimension_numbers = #tpu.dot_dimension_numbers<[1], [0], [0], [1], [0, 0, 1, 1], [], []>} : vector<32x16xbf16>, vector<16x100xbf16>, vector<32x100xf32> -> vector<32x100xf32>
    %c0_124 = arith.constant 0 : index
    %c0_125 = arith.constant 0 : index
    %203 = vector.load %arg20[%c0_124, %c0_125] : memref<32x1xf32, #tpu.memory_space<vmem>>, vector<32x1xf32>
    %204 = vector.broadcast %203 : vector<32x1xf32> to vector<32x100xf32>
    %205 = arith.addf %202, %204 : vector<32x100xf32>
    %cst_126 = arith.constant 0.000000e+00 : f32
    %206 = vector.broadcast %cst_126 : f32 to vector<32x100xf32>
    %207 = arith.subf %206, %205 : vector<32x100xf32>
    %208 = math.exp %207 : vector<32x100xf32>
    %cst_127 = arith.constant 1.000000e+00 : f32
    %209 = vector.broadcast %cst_127 : f32 to vector<32x100xf32>
    %210 = arith.addf %209, %208 : vector<32x100xf32>
    %211 = tpu.reciprocal %210 {approx = true} : vector<32x100xf32> -> vector<32x100xf32>
    %212 = arith.mulf %205, %211 : vector<32x100xf32>
    %213 = vector.broadcast %0 : vector<1x100xf32> to vector<32x100xf32>
    %214 = arith.mulf %212, %213 : vector<32x100xf32>
    %cst_128 = arith.constant dense<0.000000e+00> : vector<32xf32>
    %215 = vector.multi_reduction <add>, %214, %cst_128 [1] : vector<32x100xf32> to vector<32xf32>
    %216 = vector.shape_cast %215 : vector<32xf32> to vector<32x1xf32>
    %cst_129 = arith.constant 1.562500e-02 : f32
    %217 = vector.broadcast %cst_129 : f32 to vector<32x1xf32>
    %218 = arith.mulf %216, %217 : vector<32x1xf32>
    %c0_130 = arith.constant 0 : index
    %c0_131 = arith.constant 0 : index
    %219 = vector.load %arg21[%c0_130, %c0_131] : memref<10x32xbf16, #tpu.memory_space<vmem>>, vector<10x32xbf16>
    %220 = arith.truncf %218 : vector<32x1xf32> to vector<32x1xbf16>
    %cst_132 = arith.constant dense<0.000000e+00> : vector<10x1xf32>
    %221 = tpu.matmul %219, %220, %cst_132 {dimension_numbers = #tpu.dot_dimension_numbers<[1], [0], [0], [1], [0, 0, 1, 1], [], []>} : vector<10x32xbf16>, vector<32x1xbf16>, vector<10x1xf32> -> vector<10x1xf32>
    %c0_133 = arith.constant 0 : index
    %c0_134 = arith.constant 0 : index
    %222 = vector.load %arg22[%c0_133, %c0_134] : memref<10x1xf32, #tpu.memory_space<vmem>>, vector<10x1xf32>
    %223 = arith.addf %221, %222 : vector<10x1xf32>
    %cst_135 = arith.constant 0.000000e+00 : f32
    %224 = vector.broadcast %cst_135 : f32 to vector<10x1xf32>
    %225 = arith.subf %224, %223 : vector<10x1xf32>
    %226 = math.exp %225 : vector<10x1xf32>
    %cst_136 = arith.constant 1.000000e+00 : f32
    %227 = vector.broadcast %cst_136 : f32 to vector<10x1xf32>
    %228 = arith.addf %227, %226 : vector<10x1xf32>
    %cst_137 = arith.constant 1.000000e+00 : f32
    %229 = vector.broadcast %cst_137 : f32 to vector<10x1xf32>
    %230 = arith.divf %229, %228 : vector<10x1xf32>
    %c0_138 = arith.constant 0 : index
    %c0_139 = arith.constant 0 : index
    %c0_140 = arith.constant 0 : index
    %231 = vector.load %arg23[%c0_138, %c0_139, %c0_140] : memref<1x10x1xf32, #tpu.memory_space<vmem>>, vector<1x10x1xf32>
    %232 = vector.shape_cast %231 : vector<1x10x1xf32> to vector<10x1xf32>
    %233 = vector.shape_cast %230 : vector<10x1xf32> to vector<1x10x1xf32>
    tpu.vector_store %arg23[%c0_138, %c0_139, %c0_140], %233 {strides = array<i32>} : memref<1x10x1xf32, #tpu.memory_space<vmem>>, vector<1x10x1xf32>,
    return
  }
  func.func @transform_0(%arg0: i32) -> (i32, i32, i32) {
    %c0_i32 = arith.constant 0 : i32
    %c0_i32_0 = arith.constant 0 : i32
    %c0_i32_1 = arith.constant 0 : i32
    return %arg0, %c0_i32, %c0_i32_0 : i32, i32, i32
  }
  func.func @transform_1(%arg0: i32) -> (i32, i32) {
    %c0_i32 = arith.constant 0 : i32
    %c0_i32_0 = arith.constant 0 : i32
    %c0_i32_1 = arith.constant 0 : i32
    return %c0_i32, %c0_i32_0 : i32, i32
  }
  func.func @transform_2(%arg0: i32) -> (i32, i32) {
    %c0_i32 = arith.constant 0 : i32
    %c0_i32_0 = arith.constant 0 : i32
    %c0_i32_1 = arith.constant 0 : i32
    return %c0_i32, %c0_i32_0 : i32, i32
  }
  func.func @transform_3(%arg0: i32) -> (i32, i32) {
    %c0_i32 = arith.constant 0 : i32
    %c0_i32_0 = arith.constant 0 : i32
    %c0_i32_1 = arith.constant 0 : i32
    return %c0_i32, %c0_i32_0 : i32, i32
  }
  func.func @transform_4(%arg0: i32) -> (i32, i32, i32) {
    %c0_i32 = arith.constant 0 : i32
    %c0_i32_0 = arith.constant 0 : i32
    %c0_i32_1 = arith.constant 0 : i32
    %c0_i32_2 = arith.constant 0 : i32
    return %c0_i32, %c0_i32_0, %c0_i32_1 : i32, i32, i32
  }
  func.func @transform_5(%arg0: i32) -> (i32, i32) {
    %c0_i32 = arith.constant 0 : i32
    %c0_i32_0 = arith.constant 0 : i32
    %c0_i32_1 = arith.constant 0 : i32
    return %c0_i32, %c0_i32_0 : i32, i32
  }
  func.func @transform_6(%arg0: i32) -> (i32, i32) {
    %c0_i32 = arith.constant 0 : i32
    %c0_i32_0 = arith.constant 0 : i32
    %c0_i32_1 = arith.constant 0 : i32
    return %c0_i32, %c0_i32_0 : i32, i32
  }
  func.func @transform_7(%arg0: i32) -> (i32, i32) {
    %c0_i32 = arith.constant 0 : i32
    %c0_i32_0 = arith.constant 0 : i32
    %c0_i32_1 = arith.constant 0 : i32
    return %c0_i32, %c0_i32_0 : i32, i32
  }
  func.func @transform_8(%arg0: i32) -> (i32, i32) {
    %c0_i32 = arith.constant 0 : i32
    %c0_i32_0 = arith.constant 0 : i32
    %c0_i32_1 = arith.constant 0 : i32
    return %c0_i32, %c0_i32_0 : i32, i32
  }
  func.func @transform_9(%arg0: i32) -> (i32, i32) {
    %c0_i32 = arith.constant 0 : i32
    %c0_i32_0 = arith.constant 0 : i32
    %c0_i32_1 = arith.constant 0 : i32
    return %c0_i32, %c0_i32_0 : i32, i32
  }
  func.func @transform_10(%arg0: i32) -> (i32, i32) {
    %c0_i32 = arith.constant 0 : i32
    %c0_i32_0 = arith.constant 0 : i32
    %c0_i32_1 = arith.constant 0 : i32
    return %c0_i32, %c0_i32_0 : i32, i32
  }
  func.func @transform_11(%arg0: i32) -> (i32, i32) {
    %c0_i32 = arith.constant 0 : i32
    %c0_i32_0 = arith.constant 0 : i32
    %c0_i32_1 = arith.constant 0 : i32
    return %c0_i32, %c0_i32_0 : i32, i32
  }
  func.func @transform_12(%arg0: i32) -> (i32, i32) {
    %c0_i32 = arith.constant 0 : i32
    %c0_i32_0 = arith.constant 0 : i32
    %c0_i32_1 = arith.constant 0 : i32
    return %c0_i32, %c0_i32_0 : i32, i32
  }
  func.func @transform_13(%arg0: i32) -> (i32, i32) {
    %c0_i32 = arith.constant 0 : i32
    %c0_i32_0 = arith.constant 0 : i32
    %c0_i32_1 = arith.constant 0 : i32
    return %c0_i32, %c0_i32_0 : i32, i32
  }
  func.func @transform_14(%arg0: i32) -> (i32, i32) {
    %c0_i32 = arith.constant 0 : i32
    %c0_i32_0 = arith.constant 0 : i32
    %c0_i32_1 = arith.constant 0 : i32
    return %c0_i32, %c0_i32_0 : i32, i32
  }
  func.func @transform_15(%arg0: i32) -> (i32, i32) {
    %c0_i32 = arith.constant 0 : i32
    %c0_i32_0 = arith.constant 0 : i32
    %c0_i32_1 = arith.constant 0 : i32
    return %c0_i32, %c0_i32_0 : i32, i32
  }
  func.func @transform_16(%arg0: i32) -> (i32, i32) {
    %c0_i32 = arith.constant 0 : i32
    %c0_i32_0 = arith.constant 0 : i32
    %c0_i32_1 = arith.constant 0 : i32
    return %c0_i32, %c0_i32_0 : i32, i32
  }
  func.func @transform_17(%arg0: i32) -> (i32, i32) {
    %c0_i32 = arith.constant 0 : i32
    %c0_i32_0 = arith.constant 0 : i32
    %c0_i32_1 = arith.constant 0 : i32
    return %c0_i32, %c0_i32_0 : i32, i32
  }
  func.func @transform_18(%arg0: i32) -> (i32, i32) {
    %c0_i32 = arith.constant 0 : i32
    %c0_i32_0 = arith.constant 0 : i32
    %c0_i32_1 = arith.constant 0 : i32
    return %c0_i32, %c0_i32_0 : i32, i32
  }
  func.func @transform_19(%arg0: i32) -> (i32, i32) {
    %c0_i32 = arith.constant 0 : i32
    %c0_i32_0 = arith.constant 0 : i32
    %c0_i32_1 = arith.constant 0 : i32
    return %c0_i32, %c0_i32_0 : i32, i32
  }
  func.func @transform_20(%arg0: i32) -> (i32, i32) {
    %c0_i32 = arith.constant 0 : i32
    %c0_i32_0 = arith.constant 0 : i32
    %c0_i32_1 = arith.constant 0 : i32
    return %c0_i32, %c0_i32_0 : i32, i32
  }
  func.func @transform_21(%arg0: i32) -> (i32, i32) {
    %c0_i32 = arith.constant 0 : i32
    %c0_i32_0 = arith.constant 0 : i32
    %c0_i32_1 = arith.constant 0 : i32
    return %c0_i32, %c0_i32_0 : i32, i32
  }
  func.func @transform_22(%arg0: i32) -> (i32, i32, i32) {
    %c0_i32 = arith.constant 0 : i32
    %c0_i32_0 = arith.constant 0 : i32
    %c0_i32_1 = arith.constant 0 : i32
    return %arg0, %c0_i32, %c0_i32_0 : i32, i32, i32
  }
}

</mosaic_0001>

<bundles_post_ra>
// kernel: cnn_model_forward.1
= control target key start
LH: loop header
LB: loop body
LE: loop exit
PB: predicated region body
PF: predicated region fallthrough
CT: control target
= control target key end

     0   :  { %s2945_s0 = inlined_call_operand.vmem [shape: bf16[2,9,100], index: 0, kind: input, shape index: {}]   ;;  %s2946_s1 = inlined_call_operand.vmem [shape: f32[1,100], index: 1, kind: input, shape index: {}]   ;;  %s2947_s2 = inlined_call_operand.vmem [shape: bf16[8,9], index: 2, kind: input, shape index: {}]   ;;  %s2948_s3 = inlined_call_operand.vmem [shape: f32[8,1], index: 3, kind: input, shape index: {}]   ;;  %s2949_s4 = inlined_call_operand.vmem [shape: bf16[9,16,8], index: 4, kind: input, shape index: {}]   ;;  %s2950_s5 = inlined_call_operand.vmem [shape: f32[16,1], index: 5, kind: input, shape index: {}]   ;;  %s2951_s6 = inlined_call_operand.vmem [shape: bf16[8,16], index: 6, kind: input, shape index: {}]   ;;  %s2952_s7 = inlined_call_operand.vmem [shape: f32[8,1], index: 7, kind: input, shape index: {}]   ;;  %s2953_s8 = inlined_call_operand.vmem [shape: bf16[32,8], index: 8, kind: input, shape index: {}]   ;;  %s2954_s9 = inlined_call_operand.vmem [shape: f32[32,1], index: 9, kind: input, shape index: {}]   ;;  %s2955_s10 = inlined_call_operand.vmem [shape: f32[32,9], index: 10, kind: input, shape index: {}]   ;;  %s2956_s11 = inlined_call_operand.vmem [shape: f32[32,1], index: 11, kind: input, shape index: {}]   ;;  %s2957_s12 = inlined_call_operand.vmem [shape: bf16[8,32], index: 12, kind: input, shape index: {}]   ;;  %s2958_s13 = inlined_call_operand.vmem [shape: f32[8,1], index: 13, kind: input, shape index: {}]   ;;  %s2959_s14 = inlined_call_operand.vmem [shape: bf16[32,8], index: 14, kind: input, shape index: {}]   ;;  %s2960_s15 = inlined_call_operand.vmem [shape: f32[32,1], index: 15, kind: input, shape index: {}]   ;;  %s2961_s16 = inlined_call_operand.vmem [shape: bf16[16,32], index: 16, kind: input, shape index: {}]   ;;  %s2962_s17 = inlined_call_operand.vmem [shape: f32[16,1], index: 17, kind: input, shape index: {}]   ;;  %s2963_s18 = inlined_call_operand.vmem [shape: bf16[32,16], index: 18, kind: input, shape index: {}]   ;;  %s2964_s19 = inlined_call_operand.vmem [shape: f32[32,1], index: 19, kind: input, shape index: {}]   ;;  %s2965_s20 = inlined_call_operand.vmem [shape: bf16[10,32], index: 20, kind: input, shape index: {}]   ;;  %s2966_s21 = inlined_call_operand.vmem [shape: f32[10,1], index: 21, kind: input, shape index: {}]   ;;  %s2967_s22 = inlined_call_operand.vmem [shape: f32[2,10,1], index: 22, kind: output, shape index: {}]  }
   0x1   :  { %2973 = sst [smem:[#allocation4_spill]] %s2945_s0 }
   0x2   :  { %2974 = sst [smem:[#allocation5_spill]] %s2946_s1 }
   0x3   :  { %2975 = sst [smem:[#allocation6_spill]] %s2947_s2 }
   0x4   :  { %2976 = sst [smem:[#allocation7_spill]] %s2948_s3  ;;  %s2500_s3 = smov 0  }
   0x5   :  { %2977 = sst [smem:[#allocation8_spill]] %s2949_s4 }
   0x6   :  { %2978 = sst [smem:[#allocation9_spill]] %s2950_s5 }
   0x7   :  { %2979 = sst [smem:[#allocation10_spill]] %s2951_s6 }
   0x8 LB: > { %s2047_s28 = sadd.s32 4294967295, %s2353_s3   ;;  %p2051_p0 = scmp.ge.s32.totalorder %s2353_s3, 1  ;;  %s2353_s3 = sphi %s2500_s3, %s32_s3  }
   0x9   : > { %p612_p1 = scmp.lt.s32.totalorder %s2353_s3, 3 }
   0xb   : > { %p613_p2 = pnand %p2051_p0, %p612_p1 }
   0xc   : > { %p674_p3 = scmp.lt.s32.totalorder (!%p613_p2), %s2047_s28, 1  ;;  %s2980_s4 = sld [smem:[#allocation7_spill]] (!%p613_p2) }
   0xd   : > { %616 = sbr.rel (%p613_p2) target bundleno = 2699 (0xa8b), region = 108  ;;  %s2981_s5 = sld [smem:[#allocation4_spill]] (!%p613_p2) }
   0xe   : > { %s2982_s26 = sld [smem:[#allocation6_spill]] (!%p613_p2)  ;;  %s2358_s30 = smov (!%p613_p2), 16  }
   0xf   : > { %s2983_s29 = sld [smem:[#allocation5_spill]] (!%p613_p2)  ;;  %s2971_s23 = smov (!%p613_p2), 123  }
  0x10   : > { %s2362_s1 = smov (!%p613_p2), 102   ;;  %s2365_s2 = smov (!%p613_p2), 103  }
  0x11   : > { %s2366_s27 = smov (!%p613_p2), 111   ;;  %s2986_s25 = sld [smem:[#allocation10_spill]] (!%p613_p2) }
  0x12   : > { %vm704_vm0 = vcmask 1043456   ;;  %v689_v0 = vld [vmem:[%s2980_s4] sm:$0xff]  ;;  %s2989_s28 = smov (!%p674_p3, %s2047_s28), 1  ;;  %v2355_v1 = vmov 0   ;;  %vm705_vm1 = vcmask 1044480   ;;  %v2356_v2 = vmov 65535  }
  0x13   : > { %2224 = vset.pattern.permute.xlu0 %v2355_v1  ;;  %2225 = vset.pattern.permute.xlu2 %v2355_v1  ;;  %v706_v3 = vsel %vm704_vm0, 4294967295, %v2356_v2  ;;  %s2166_s0 = sshll.u32 %s2989_s28, 3  ;;  %vm700_vm2 = vcmask 72704   ;;  %v2357_v10 = vmov 0.0   ;;  %vm740_vm3 = vcmask 949376   ;;  %s2359_s4 = smov 112  }
  0x14   : > { %692 = vperm.xlu0 %2224, %v689_v0   ;;  %2226 = vset.pattern.permute.xlu1 %v2355_v1  ;;  %s678_s24 = scalar_lea.vmem %s2981_s5, %s2166_s0  ;;  %v707_v6 = vsel %vm705_vm1, %v706_v3, 0  ;;  %v688_v9 = vld [vmem:[%s2982_s26] sm:$0xf]  ;;  %734 = vst [vmem:[#allocation2] sm:$0xff] %v2357_v10  ;;  %s2360_s0 = smov 121   ;;  %v1091_v27 = vld [vmem:[%s2954_s9 + $0x18] sm:$0xff] }
  0x15   : > { %v2058_v4 = vld [vmem:[%s678_s24] sm:$0xf]  ;;  %v2168_v5 = vld [vmem:[%s678_s24] sm:$0x10]  ;;  %1178 = vst [vmem:[#allocation3] sm:$0xff] %v2357_v10  ;;  %s2363_s5 = smov 113  }
  0x16   : > { %v2059_v7 = vor.u32 %v2168_v5, %v2058_v4  ;;  %1180 = vst [vmem:[#allocation3 + $0x10] sm:$0xff] %v2357_v10  ;;  %v2527_v19 = vld [vmem:[%s2983_s29] ss:$0 sm:$0xff]  ;;  %s2364_s24 = smov 122   ;;  %s2984_s26 = sld [smem:[#allocation9_spill]]  ;;  %vm756_vm4 = vcmask 64512  }
  0x17   : > { %1182 = vst [vmem:[#allocation3 + $0x20] sm:$0xff] %v2357_v10  ;;  %v1090_v49 = vld [vmem:[%s2954_s9 + $0x10] sm:$0xff]  ;;  %v1089_v53 = vld [vmem:[%s2954_s9 + $0x8] sm:$0xff]  ;;  %vm1065_vm5 = vcmask 130048   ;;  %s2382_s6 = smov 107   ;;  %vm1633_vm6 = vcmask 818176  }
  0x18   : > { %v709_v8 = vand.u32 %v2059_v7, %v707_v6  ;;  %1184 = vst [vmem:[#allocation3 + $0x30] sm:$0xff] %v2357_v10  ;;  %vm1654_vm7 = vcmask 261120   ;;  %vm1988_vm11 = vcmask 7168  }
  0x1a   : > { %718 = vmatpush.bf16.msra.mxu3 %v709_v8 }
  0x1c   : > { %v743_v26 = vld [vmem:[%s2984_s26 + $0x8] sm:$0xff]  ;;  %v742_v42 = vld [vmem:[%s2984_s26] sm:$0xff] }
  0x1d   : > { %2060 = vmatmul.msk.bf16.vlgmr.msra.gmra.mxu3 %vm700_vm2, %v688_v9 }
  0x86   : > { %v693_v11 = vpop.permute.xlu0 %692 }
  0xa0   : > { %v720_v12 = vpop.f32.mrf.mxu3 }
  0xa1   : > { %v721_v13 = vadd.f32 %v720_v12, %v693_v11 }
  0xa3   : > { %v724_v14 = vsub.f32 0.0, %v721_v13 }
  0xa5   : > { %v725_v15 = vmul.f32 1.442695, %v724_v14 }
  0xa7   : > { %2258 = vpow2.f32 %v725_v15 }
  0xa8   : > { %v722_v16 = vpop.f32.mrf.mxu3 }
  0xad   : > { %v2259_v17 = vpop.eup %2258 }
  0xae   : > { %v727_v18 = vadd.f32 1.0, %v2259_v17 }
  0xb0   : > { %2260 = vrcp.f32 %v727_v18 }
  0xb6   : > { %v2261_v20 = vpop.eup %2260 }
  0xb7   : > { %v729_v21 = vmul.f32 %v2261_v20, %v721_v13 }
  0xb9   : > { %v2530_v22 = vmul.f32 %v2527_v19, %v729_v21 }
  0xbb   : > { %737 = vrot.lane.b32.xlu0 %v2530_v22, %s2358_s30 }
 0x12d   : > { %v738_v23 = vpop.permute.xlu0 %737 }
 0x12e   : > { %741 = vst.msk [vmem:[#allocation2] sm:$0xff] %vm740_vm3, %v738_v23 }
 0x135   : > { %v744_v24 = vld [vmem:[#allocation2] sm:$0xff] }
 0x136   : > { %v747_v25 = vpack.c.bf16 %v744_v24, %v744_v24 }
 0x138   : > { %893 = vrot.lane.b32.xlu0 %v747_v25, %s2359_s4  ;;  %829 = vrot.lane.b32.xlu2 %v747_v25, %s2360_s0  ;;  %s2378_s4 = smov 126   ;;  %s2379_s0 = smov 117  }
 0x139   : > { %754 = vrot.lane.b32.xlu1 %v747_v25, %s2971_s23  ;;  %s2367_s23 = smov 101  }
 0x140   : > { %989 = vrot.lane.b32.xlu0 %v747_v25, %s2362_s1  ;;  %861 = vrot.lane.b32.xlu2 %v747_v25, %s2363_s5  ;;  %s2380_s1 = smov 108   ;;  %s2381_s5 = smov 116  }
 0x141   : > { %797 = vrot.lane.b32.xlu1 %v747_v25, %s2364_s24  ;;  %s2985_s24 = sld [smem:[#allocation8_spill]] }
 0x147   : > { %v2171_v30 = vld [vmem:[%s2985_s24 + $0x10] sm:$0xff]  ;;  %v2172_v33 = vld [vmem:[%s2985_s24 + $0x18] sm:$0xff]  ;;  %v2169_v41 = vld [vmem:[%s2985_s24] sm:$0xff] }
 0x148   : > { %784 = vperm.xlu0 %2224, %v743_v26   ;;  %957 = vrot.lane.b32.xlu2 %v747_v25, %s2365_s2  ;;  %v2175_v36 = vld [vmem:[%s2985_s24 + $0x30] sm:$0xff]  ;;  %v2176_v46 = vld [vmem:[%s2985_s24 + $0x38] sm:$0xff]  ;;  %v2170_v48 = vld [vmem:[%s2985_s24 + $0x8] sm:$0xff]  ;;  %s2987_s2 = smov 123  }
 0x149   : > { %925 = vrot.lane.b32.xlu1 %v747_v25, %s2366_s27  ;;  %v2173_v52 = vld [vmem:[%s2985_s24 + $0x20] sm:$0xff]  ;;  %v2174_v56 = vld [vmem:[%s2985_s24 + $0x28] sm:$0xff]  ;;  %s2377_s27 = smov 127  }
 0x14a   : > { %v2177_v57 = vld [vmem:[%s2985_s24 + $0x40] sm:$0xff] }
 0x150   : > { %1109 = vperm.xlu0 %2224, %v1091_v27   ;;  %779 = vperm.xlu2 %2225, %v742_v42  }
 0x151   : > { %1021 = vrot.lane.b32.xlu1 %v747_v25, %s2367_s23  ;;  %s2384_s23 = smov 5  }
 0x158   : > { %1104 = vperm.xlu2 %2225, %v1090_v49  }
 0x160   : > { %1099 = vperm.xlu2 %2225, %v1089_v53   ;;  %v2614_v53 = vld [vmem:[%s2955_s10 + $0x10] sm:$0xff] }
 0x192   : > { %v830_v28 = vpop.permute.xlu2 %829 }
 0x193   : > { %v835_v29 = vsel %vm704_vm0, %v830_v28, 0 }
 0x194   : > { %844 = vmatpush.bf16.msrb.mxu3 %v835_v29 }
 0x197   : > { %2079 = vmatmul.msk.bf16.vlgmr.msrb.gmra.mxu3 %vm756_vm4, %v2171_v30 }
 0x19a   : > { %v862_v31 = vpop.permute.xlu2 %861 }
 0x19b   : > { %v867_v32 = vsel %vm704_vm0, %v862_v31, 0 }
 0x19c   : > { %876 = vmatpush.bf16.msra.mxu0 %v867_v32 }
 0x19f   : > { %2086 = vmatmul.msk.bf16.vlgmr.msra.gmra.mxu0 %vm756_vm4, %v2172_v33 }
 0x1a2   : > { %v958_v34 = vpop.permute.xlu2 %957 }
 0x1a3   : > { %v963_v35 = vsel %vm704_vm0, %v958_v34, 0  ;;  %v1059_v34 = vld [vmem:[%s2952_s7] sm:$0xff] }
 0x1a4   : > { %972 = vmatpush.bf16.msra.mxu3 %v963_v35  ;;  %1062 = vperm.xlu1 %2226, %v1059_v34  }
 0x1a7   : > { %2107 = vmatmul.msk.bf16.vlgmr.msra.gmra.mxu3 %vm756_vm4, %v2175_v36 }
 0x1aa   : > { %v894_v37 = vpop.permute.xlu0 %893  ;;  %v780_v61 = vpop.permute.xlu2 %779 }
 0x1ab   : > { %v755_v38 = vpop.permute.xlu1 %754  ;;  %v899_v39 = vsel %vm704_vm0, %v894_v37, 0 }
 0x1ac   : > { %v761_v40 = vsel %vm704_vm0, %v755_v38, 0 }
 0x1ad   : > { %770 = vmatpush.bf16.msra.mxu1 %v761_v40 }
 0x1b0   : > { %2065 = vmatmul.msk.bf16.vlgmr.msra.gmra.mxu1 %vm756_vm4, %v2169_v41 }
 0x1b1   : > { %908 = vmatpush.bf16.msrb.mxu1 %v899_v39  ;;  %v1088_v39 = vld [vmem:[%s2954_s9] sm:$0xff] }
 0x1b2   : > { %v990_v43 = vpop.permute.xlu0 %989  ;;  %1094 = vperm.xlu1 %2226, %v1088_v39  }
 0x1b3   : > { %v798_v44 = vpop.permute.xlu1 %797  ;;  %v995_v45 = vsel %vm704_vm0, %v990_v43, 0 }
 0x1b4   : > { %v803_v47 = vsel %vm704_vm0, %v798_v44, 0  ;;  %1004 = vmatpush.bf16.msrb.mxu0 %v995_v45 }
 0x1b5   : > { %812 = vmatpush.bf16.msra.mxu2 %v803_v47 }
 0x1b7   : > { %2114 = vmatmul.msk.bf16.vlgmr.msrb.gmra.mxu0 %vm756_vm4, %v2176_v46 }
 0x1b8   : > { %2072 = vmatmul.msk.bf16.vlgmr.msra.gmra.mxu2 %vm756_vm4, %v2170_v48 }
 0x1ba   : > { %v785_v5 = vpop.permute.xlu0 %784 }
 0x1bb   : > { %v926_v50 = vpop.permute.xlu1 %925 }
 0x1bc   : > { %v931_v51 = vsel %vm704_vm0, %v926_v50, 0  ;;  %v1057_v50 = vld [vmem:[%s2986_s25] sm:$0xf]  ;;  %s2383_s25 = smov 106  }
 0x1bd   : > { %940 = vmatpush.bf16.msrb.mxu2 %v931_v51  ;;  %v2609_v51 = vld [vmem:[%s2955_s10 + $0x18] sm:$0xff] }
 0x1c0   : > { %2093 = vmatmul.msk.bf16.vlgmr.msrb.gmra.mxu1 %vm756_vm4, %v2173_v52  ;;  %v2368_v52 = vmov 1  }
 0x1c1   : > { %2228 = vset.pattern.permute.xlu2 %v2368_v52  ;;  %2227 = vset.pattern.permute.xlu1 %v2368_v52 }
 0x1c2   : > { %1279 = vperm.xlu2 %2228, %v2609_v51   ;;  %1275 = vperm.xlu1 %2227, %v2614_v53  }
 0x1c3   : > { %v1022_v54 = vpop.permute.xlu1 %1021 }
 0x1c4   : > { %v1027_v55 = vsel %vm704_vm0, %v1022_v54, 0  ;;  %v2369_v54 = vmov 2  }
 0x1c5   : > { %1036 = vmatpush.bf16.msra.mxu1 %v1027_v55  ;;  %2229 = vset.pattern.permute.xlu0 %v2369_v54 }
 0x1c6   : > { %1315 = vperm.xlu0 %2229, %v2614_v53  }
 0x1c8   : > { %2100 = vmatmul.msk.bf16.vlgmr.msrb.gmra.mxu2 %vm756_vm4, %v2174_v56 }
 0x1ca   : > { %2230 = vset.pattern.permute.xlu1 %v2369_v54 }
 0x1cb   : > { %1319 = vperm.xlu1 %2230, %v2609_v51  }
 0x1d0   : > { %2121 = vmatmul.msk.bf16.vlgmr.msra.gmra.mxu1 %vm756_vm4, %v2177_v57 }
 0x1d3   : > { %2231 = vset.pattern.permute.xlu1 %v2368_v52 }
 0x216   : > { %v1063_v55 = vpop.permute.xlu1 %1062 }
 0x21a   : > { %v846_v60 = vpop.f32.mrf.mxu3 }
 0x21c   : > { %v878_v62 = vpop.f32.mrf.mxu0 }
 0x222   : > { %v848_v4 = vpop.f32.mrf.mxu3 }
 0x224   : > { %v880_v7 = vpop.f32.mrf.mxu0 }
 0x22a   : > { %v974_v15 = vpop.f32.mrf.mxu3 }
 0x22d   : > { %v772_v58 = vpop.f32.mrf.mxu1 }
 0x22e   : > { %v787_v0 = vadd.f32 %v780_v61, %v772_v58  ;;  %v2622_v58 = vld [vmem:[%s2955_s10] sm:$0xff] }
 0x22f   : > { %1267 = vperm.xlu2 %2228, %v2622_v58  }
 0x232   : > { %v976_v30 = vpop.f32.mrf.mxu3 }
 0x234   : > { %v1006_v18 = vpop.f32.mrf.mxu0 }
 0x235   : > { %v774_v59 = vpop.f32.mrf.mxu1 }
 0x236   : > { %v788_v9 = vadd.f32 %v785_v5, %v774_v59  ;;  %v2373_v5 = vmov 7  }
 0x23b   : > { %v814_v63 = vpop.f32.mrf.mxu2 }
 0x23c   : > { %v819_v3 = vadd.f32 %v814_v63, %v787_v0  ;;  %v1008_v33 = vpop.f32.mrf.mxu0  ;;  %v2370_v63 = vmov 3  }
 0x23d   : > { %v910_v2 = vpop.f32.mrf.mxu1  ;;  %2233 = vset.pattern.permute.xlu0 %v2370_v63  ;;  %2232 = vset.pattern.permute.xlu2 %v2370_v63 }
 0x23e   : > { %v851_v6 = vadd.f32 %v846_v60, %v819_v3  ;;  %1359 = vperm.xlu0 %2233, %v2609_v51   ;;  %1355 = vperm.xlu2 %2232, %v2614_v53   ;;  %v2371_v3 = vmov 5  }
 0x240   : > { %v883_v11 = vadd.f32 %v878_v62, %v851_v6  ;;  %v2178_v62 = vld [vmem:[%s2953_s8] sm:$0xff]  ;;  %v2374_v6 = vmov 6  }
 0x242   : > { %v915_v13 = vadd.f32 %v910_v2, %v883_v11  ;;  %v2179_v2 = vld [vmem:[%s2953_s8 + $0x8] sm:$0xff]  ;;  %v1213_v11 = vld [vmem:[%s2956_s11 + $0x18] sm:$0xff] }
 0x243   : > { %v816_v8 = vpop.f32.mrf.mxu2 }
 0x244   : > { %v820_v12 = vadd.f32 %v816_v8, %v788_v9  ;;  %v1105_v8 = vpop.permute.xlu2 %1104 }
 0x245   : > { %v912_v10 = vpop.f32.mrf.mxu1 }
 0x246   : > { %v852_v14 = vadd.f32 %v848_v4, %v820_v12  ;;  %1347 = vperm.xlu0 %2233, %v2622_v58   ;;  %2235 = vset.pattern.permute.xlu2 %v2369_v54  ;;  %v2372_v4 = vmov 4  }
 0x248   : > { %v884_v20 = vadd.f32 %v880_v7, %v852_v14  ;;  %v2375_v7 = vmov 8   ;;  %v1210_v14 = vld [vmem:[%s2956_s11] sm:$0xff] }
 0x24a   : > { %v916_v25 = vadd.f32 %v912_v10, %v884_v20  ;;  %v1212_v20 = vld [vmem:[%s2956_s11 + $0x10] sm:$0xff] }
 0x24b   : > { %v942_v16 = vpop.f32.mrf.mxu2 }
 0x24c   : > { %v947_v17 = vadd.f32 %v942_v16, %v915_v13  ;;  %v1100_v9 = vpop.permute.xlu2 %1099  ;;  %v1211_v13 = vld [vmem:[%s2956_s11 + $0x8] sm:$0xff]  ;;  %v1095_v16 = vpop.permute.xlu1 %1094 }
 0x24d   : > { %v1038_v23 = vpop.f32.mrf.mxu1 }
 0x24e   : > { %v979_v21 = vadd.f32 %v974_v15, %v947_v17  ;;  %2240 = vset.pattern.permute.xlu0 %v2371_v3 }
 0x24f   : > { %1439 = vperm.xlu0 %2240, %v2609_v51  }
 0x250   : > { %v1011_v24 = vadd.f32 %v1006_v18, %v979_v21 }
 0x252   : > { %v1043_v26 = vadd.f32 %v1038_v23, %v1011_v24 }
 0x253   : > { %v944_v27 = vpop.f32.mrf.mxu2 }
 0x254   : > { %v1045_v28 = vsub.f32 0.0, %v1043_v26  ;;  %v948_v29 = vadd.f32 %v944_v27, %v916_v25  ;;  %v2674_v10 = vpop.permute.xlu2 %1279 }
 0x255   : > { %v1040_v36 = vpop.f32.mrf.mxu1 }
 0x256   : > { %v1047_v31 = vmul.f32 1.442695, %v1045_v28  ;;  %v980_v32 = vadd.f32 %v976_v30, %v948_v29 }
 0x257   : > { %1427 = vperm.xlu0 %2240, %v2622_v58  }
 0x258   : > { %v1012_v35 = vadd.f32 %v1008_v33, %v980_v32  ;;  %2262 = vpow2.f32 %v1047_v31  ;;  %v2697_v31 = vpop.permute.xlu1 %1275 }
 0x25a   : > { %v1044_v37 = vadd.f32 %v1040_v36, %v1012_v35 }
 0x25c   : > { %v1046_v38 = vsub.f32 0.0, %v1044_v37 }
 0x25e   : > { %v1049_v40 = vmul.f32 1.442695, %v1046_v38  ;;  %v2263_v41 = vpop.eup %2262 }
 0x25f   : > { %v1051_v42 = vadd.f32 1.0, %v2263_v41  ;;  %2247 = vset.pattern.permute.xlu0 %v2373_v5  ;;  %v1110_v41 = vpop.permute.xlu0 %1109 }
 0x260   : > { %2264 = vpow2.f32 %v1049_v40  ;;  %1519 = vperm.xlu0 %2247, %v2609_v51  }
 0x261   : > { %2266 = vrcp.f32 %v1051_v42 }
 0x266   : > { %v2265_v43 = vpop.eup %2264 }
 0x267   : > { %v1052_v44 = vadd.f32 1.0, %v2265_v43  ;;  %v2267_v45 = vpop.eup %2266 }
 0x268   : > { %v1055_v47 = vmul.f32 %v2267_v45, %v1043_v26  ;;  %1507 = vperm.xlu0 %2247, %v2622_v58   ;;  %v2702_v45 = vpop.permute.xlu1 %1319 }
 0x269   : > { %2268 = vrcp.f32 %v1052_v44 }
 0x26f   : > { %v2269_v46 = vpop.eup %2268 }
 0x270   : > { %v1056_v48 = vmul.f32 %v2269_v46, %v1044_v37  ;;  %2253 = vset.pattern.permute.xlu0 %v2375_v7 }
 0x272   : > { %v1058_v49 = vpack.c.bf16 %v1056_v48, %v1055_v47 }
 0x274   : > { %1076 = vmatpush.bf16.msra.mxu2 %v1058_v49 }
 0x277   : > { %2122 = vmatmul.msk.bf16.vlgmr.msra.gmra.mxu2 %vm1065_vm5, %v1057_v50 }
 0x289   : > { %v2679_v12 = vpop.permute.xlu2 %1267 }
 0x2fa   : > { %v1078_v56 = vpop.f32.mrf.mxu2 }
 0x2fb   : > { %v1079_v57 = vadd.f32 %v1078_v56, %v1063_v55 }
 0x2fd   : > { %v1082_v59 = vadd.f32 %v1079_v57, %v2530_v22  ;;  %v2637_v22 = vld [vmem:[%s2955_s10 + $0x8] sm:$0xff] }
 0x2fe   : > { %1271 = vperm.xlu1 %2231, %v2637_v22   ;;  %1311 = vperm.xlu2 %2235, %v2637_v22  }
 0x2ff   : > { %v1087_v60 = vpack.c.bf16 %v1082_v59, %v1082_v59  ;;  %1551 = vperm.xlu0 %2253, %v2637_v22  }
 0x301   : > { %v1129_v61 = vsel %vm704_vm0, %v1087_v60, 0 }
 0x302   : > { %v1080_v0 = vpop.f32.mrf.mxu2  ;;  %1138 = vmatpush.bf16.msrb.mxu3 %v1129_v61  ;;  %v2715_v61 = vpop.permute.xlu0 %1315 }
 0x305   : > { %2131 = vmatmul.msk.bf16.vlgmr.msrb.gmra.mxu3 %vm756_vm4, %v2178_v62 }
 0x306   : > { %2234 = vset.pattern.permute.xlu1 %v2369_v54  ;;  %2237 = vset.pattern.permute.xlu2 %v2372_v4 }
 0x307   : > { %1307 = vperm.xlu1 %2234, %v2622_v58   ;;  %1399 = vperm.xlu2 %2237, %v2609_v51  }
 0x308   : > { %2256 = vset.pattern.permute.xlu0 %v2355_v1 }
 0x309   : > { %1220 = vperm.xlu0 %2256, %v2622_v58  }
 0x30f   : > { %2236 = vset.pattern.permute.xlu1 %v2372_v4  ;;  %2239 = vset.pattern.permute.xlu2 %v2371_v3 }
 0x310   : > { %1395 = vperm.xlu1 %2236, %v2614_v53   ;;  %1435 = vperm.xlu2 %2239, %v2614_v53  }
 0x311   : > { %1249 = vperm.xlu0 %2256, %v1211_v13  }
 0x315   : > { %2132 = vmatmul.msk.bf16.gmra.mxu3 %vm756_vm4, %v2179_v2 }
 0x318   : > { %2238 = vset.pattern.permute.xlu1 %v2370_v63  ;;  %2242 = vset.pattern.permute.xlu2 %v2372_v4 }
 0x319   : > { %1351 = vperm.xlu1 %2238, %v2637_v22   ;;  %1391 = vperm.xlu2 %2242, %v2637_v22  }
 0x321   : > { %2241 = vset.pattern.permute.xlu1 %v2372_v4  ;;  %2244 = vset.pattern.permute.xlu2 %v2374_v6 }
 0x322   : > { %1387 = vperm.xlu1 %2241, %v2622_v58   ;;  %1479 = vperm.xlu2 %2244, %v2609_v51  }
 0x32a   : > { %2243 = vset.pattern.permute.xlu1 %v2374_v6  ;;  %2246 = vset.pattern.permute.xlu2 %v2373_v5 }
 0x32b   : > { %1475 = vperm.xlu1 %2243, %v2614_v53   ;;  %1515 = vperm.xlu2 %2246, %v2614_v53  }
 0x333   : > { %2245 = vset.pattern.permute.xlu1 %v2371_v3  ;;  %2249 = vset.pattern.permute.xlu2 %v2374_v6  ;;  %v2721_v3 = vpop.permute.xlu0 %1359 }
 0x334   : > { %1431 = vperm.xlu1 %2245, %v2637_v22   ;;  %1471 = vperm.xlu2 %2249, %v2637_v22  }
 0x33c   : > { %2248 = vset.pattern.permute.xlu1 %v2374_v6  ;;  %2251 = vset.pattern.permute.xlu2 %v2375_v7  ;;  %v1348_v6 = vpop.permute.xlu0 %1347 }
 0x33d   : > { %1467 = vperm.xlu1 %2248, %v2622_v58   ;;  %1559 = vperm.xlu2 %2251, %v2609_v51  }
 0x345   : > { %2250 = vset.pattern.permute.xlu1 %v2375_v7  ;;  %1547 = vperm.xlu2 %2251, %v2622_v58  }
 0x346   : > { %1555 = vperm.xlu1 %2250, %v2614_v53  }
 0x34d   : > { %2255 = vset.pattern.permute.xlu2 %v2355_v1 }
 0x34e   : > { %2252 = vset.pattern.permute.xlu1 %v2373_v5  ;;  %1235 = vperm.xlu2 %2255, %v2609_v51  }
 0x34f   : > { %1511 = vperm.xlu1 %2252, %v2637_v22  }
 0x356   : > { %1259 = vperm.xlu2 %2255, %v1213_v11  }
 0x357   : > { %2254 = vset.pattern.permute.xlu1 %v2355_v1  ;;  %v2687_v1 = vpop.permute.xlu2 %1355 }
 0x358   : > { %1230 = vperm.xlu1 %2254, %v2614_v53  }
 0x35e   : > { %1244 = vperm.xlu2 %2255, %v1210_v14  }
 0x35f   : > { %v2689_v15 = vpop.permute.xlu2 %1311 }
 0x360   : > { %1254 = vperm.xlu1 %2254, %v1212_v20  }
 0x367   : > { %v2694_v24 = vpop.permute.xlu2 %1399 }
 0x368   : > { %1225 = vperm.xlu1 %2254, %v2637_v22  }
 0x36f   : > { %v2699_v34 = vpop.permute.xlu2 %1435 }
 0x370   : > { %v2709_v54 = vpop.permute.xlu1 %1271 }
 0x377   : > { %v2705_v47 = vpop.permute.xlu2 %1391 }
 0x379   : > { %v1308_v62 = vpop.permute.xlu1 %1307 }
 0x37f   : > { %v2711_v56 = vpop.permute.xlu2 %1479 }
 0x382   : > { %v2723_v4 = vpop.permute.xlu1 %1395 }
 0x387   : > { %v2717_v22 = vpop.permute.xlu2 %1515 }
 0x388   : > { %v1140_v17 = vpop.f32.mrf.mxu3 }
 0x389   : > { %v1141_v18 = vadd.f32 %v1140_v17, %v1095_v16 }
 0x38b   : > { %v1150_v21 = vsub.f32 0.0, %v1141_v18  ;;  %v1352_v7 = vpop.permute.xlu1 %1351 }
 0x38d   : > { %v1154_v23 = vmul.f32 1.442695, %v1150_v21 }
 0x38f   : > { %2270 = vpow2.f32 %v1154_v23  ;;  %v2725_v5 = vpop.permute.xlu2 %1471 }
 0x390   : > { %v1142_v25 = vpop.f32.mrf.mxu3 }
 0x391   : > { %v1143_v26 = vadd.f32 %v1142_v25, %v1100_v9  ;;  %v2729_v9 = vpop.permute.xlu0 %1439 }
 0x393   : > { %v1151_v27 = vsub.f32 0.0, %v1143_v26 }
 0x394   : > { %v1388_v11 = vpop.permute.xlu1 %1387 }
 0x395   : > { %v2271_v28 = vpop.eup %2270  ;;  %v1156_v29 = vmul.f32 1.442695, %v1151_v27 }
 0x396   : > { %v1162_v30 = vadd.f32 1.0, %v2271_v28 }
 0x397   : > { %2272 = vpow2.f32 %v1156_v29 }
 0x398   : > { %2274 = vrcp.f32 %v1162_v30  ;;  %v1145_v32 = vpop.f32.mrf.mxu3 }
 0x399   : > { %v1146_v33 = vadd.f32 %v1145_v32, %v1105_v8  ;;  %v2727_v8 = vpop.permute.xlu2 %1559  ;;  %v1428_v14 = vpop.permute.xlu0 %1427 }
 0x39b   : > { %v1152_v35 = vsub.f32 0.0, %v1146_v33 }
 0x39d   : > { %v2273_v36 = vpop.eup %2272  ;;  %v1158_v37 = vmul.f32 1.442695, %v1152_v35  ;;  %v2733_v16 = vpop.permute.xlu1 %1475 }
 0x39e   : > { %v2275_v38 = vpop.eup %2274  ;;  %v1163_v39 = vadd.f32 1.0, %v2273_v36 }
 0x39f   : > { %v1170_v40 = vmul.f32 %v2275_v38, %v1141_v18  ;;  %2276 = vpow2.f32 %v1158_v37 }
 0x3a0   : > { %2278 = vrcp.f32 %v1163_v39  ;;  %v1147_v42 = vpop.f32.mrf.mxu3 }
 0x3a1   : > { %v1148_v43 = vadd.f32 %v1147_v42, %v1110_v41  ;;  %v1174_v44 = vmul.f32 %v2527_v19, %v1170_v40  ;;  %v2731_v13 = vpop.permute.xlu2 %1547  ;;  %v2737_v18 = vpop.permute.xlu0 %1519 }
 0x3a3   : > { %v1153_v46 = vsub.f32 0.0, %v1148_v43  ;;  %1190 = vrot.lane.b32.xlu2 %v1174_v44, %s2358_s30 }
 0x3a5   : > { %v2277_v48 = vpop.eup %2276  ;;  %v1160_v49 = vmul.f32 1.442695, %v1153_v46 }
 0x3a6   : > { %v2279_v50 = vpop.eup %2278  ;;  %v1164_v51 = vadd.f32 1.0, %v2277_v48  ;;  %v1432_v20 = vpop.permute.xlu1 %1431 }
 0x3a7   : > { %v1171_v52 = vmul.f32 %v2279_v50, %v1143_v26  ;;  %2280 = vpow2.f32 %v1160_v49 }
 0x3a8   : > { %2282 = vrcp.f32 %v1164_v51 }
 0x3a9   : > { %v1175_v53 = vmul.f32 %v2527_v19, %v1171_v52  ;;  %v2735_v17 = vpop.permute.xlu2 %1235  ;;  %v1508_v23 = vpop.permute.xlu0 %1507 }
 0x3ab   : > { %1192 = vrot.lane.b32.xlu0 %v1175_v53, %s2358_s30 }
 0x3ad   : > { %v2281_v55 = vpop.eup %2280 }
 0x3ae   : > { %v2283_v57 = vpop.eup %2282  ;;  %v1165_v58 = vadd.f32 1.0, %v2281_v55 }
 0x3af   : > { %v1172_v59 = vmul.f32 %v2283_v57, %v1146_v33  ;;  %v1468_v25 = vpop.permute.xlu1 %1467 }
 0x3b0   : > { %2284 = vrcp.f32 %v1165_v58 }
 0x3b1   : > { %v1176_v60 = vmul.f32 %v2527_v19, %v1172_v59  ;;  %v2739_v21 = vpop.permute.xlu2 %1259  ;;  %v2741_v27 = vpop.permute.xlu0 %1551 }
 0x3b3   : > { %1194 = vrot.lane.b32.xlu0 %v1176_v60, %s2358_s30 }
 0x3b6   : > { %v2285_v63 = vpop.eup %2284 }
 0x3b7   : > { %v1173_v0 = vmul.f32 %v2285_v63, %v1148_v43 }
 0x3b8   : > { %v2743_v28 = vpop.permute.xlu1 %1555 }
 0x3b9   : > { %v1177_v2 = vmul.f32 %v2527_v19, %v1173_v0  ;;  %v1245_v26 = vpop.permute.xlu2 %1244  ;;  %v1221_v30 = vpop.permute.xlu0 %1220 }
 0x3bb   : > { %1196 = vrot.lane.b32.xlu1 %v1177_v2, %s2358_s30  ;;  %s2376_s30 = smov 118  }
 0x3c1   : > { %v1512_v33 = vpop.permute.xlu1 %1511  ;;  %v1250_v43 = vpop.permute.xlu0 %1249 }
 0x3fd   : > { %v1191_v29 = vpop.permute.xlu2 %1190 }
 0x3fe   : > { %1202 = vst.msk [vmem:[#allocation3] sm:$0xff] %vm740_vm3, %v1191_v29 }
 0x405   : > { %v2746_v32 = vld [vmem:[#allocation3] sm:$0xff] }
 0x406   : > { %v1238_v35 = vmul.f32 %v1221_v30, %v2746_v32  ;;  %v1362_v36 = vmul.f32 %v1348_v6, %v2746_v32  ;;  %v1282_v37 = vmul.f32 %v2679_v12, %v2746_v32  ;;  %v1322_v38 = vmul.f32 %v1308_v62, %v2746_v32  ;;  %v1231_v12 = vpop.permute.xlu1 %1230 }
 0x407   : > { %v1482_v40 = vmul.f32 %v1468_v25, %v2746_v32  ;;  %v1402_v41 = vmul.f32 %v1388_v11, %v2746_v32  ;;  %v1442_v42 = vmul.f32 %v1428_v14, %v2746_v32  ;;  %v1522_v44 = vmul.f32 %v1508_v23, %v2746_v32 }
 0x408   : > { %1370 = vrot.lane.b32.xlu2 %v1362_v36, %s2376_s30  ;;  %1290 = vrot.lane.b32.xlu0 %v1282_v37, %s2377_s27  ;;  %v2755_v39 = vadd.f32 %v1245_v26, %v1238_v35 }
 0x409   : > { %1330 = vrot.lane.b32.xlu1 %v1322_v38, %s2378_s4 }
 0x40e   : > { %v1255_v46 = vpop.permute.xlu1 %1254 }
 0x410   : > { %1410 = vrot.lane.b32.xlu0 %v1402_v41, %s2379_s0  ;;  %1490 = vrot.lane.b32.xlu2 %v1482_v40, %s2380_s1 }
 0x411   : > { %1450 = vrot.lane.b32.xlu1 %v1442_v42, %s2381_s5 }
 0x416   : > { %v1226_v49 = vpop.permute.xlu1 %1225 }
 0x418   : > { %1530 = vrot.lane.b32.xlu0 %v1522_v44, %s2382_s6 }
 0x41d   : > { %v1193_v48 = vpop.permute.xlu0 %1192 }
 0x41e   : > { %1203 = vst.msk [vmem:[#allocation3 + $0x10] sm:$0xff] %vm740_vm3, %v1193_v48 }
 0x425   : > { %v1195_v50 = vpop.permute.xlu0 %1194  ;;  %v1215_v51 = vld [vmem:[#allocation3 + $0x10] sm:$0xff] }
 0x426   : > { %1204 = vst.msk [vmem:[#allocation3 + $0x20] sm:$0xff] %vm740_vm3, %v1195_v50  ;;  %v1239_v52 = vmul.f32 %v1226_v49, %v1215_v51  ;;  %v1283_v53 = vmul.f32 %v2709_v54, %v1215_v51  ;;  %v1363_v55 = vmul.f32 %v1352_v7, %v1215_v51  ;;  %v1323_v57 = vmul.f32 %v2689_v15, %v1215_v51 }
 0x427   : > { %v1523_v58 = vmul.f32 %v1512_v33, %v1215_v51  ;;  %v1403_v63 = vmul.f32 %v2705_v47, %v1215_v51  ;;  %v1483_v54 = vmul.f32 %v2725_v5, %v1215_v51  ;;  %v1443_v0 = vmul.f32 %v1432_v20, %v1215_v51 }
 0x428   : > { %1292 = vrot.lane.b32.xlu1 %v1283_v53, %s2377_s27  ;;  %1372 = vrot.lane.b32.xlu0 %v1363_v55, %s2376_s30  ;;  %v2772_v59 = vadd.f32 %v1250_v43, %v1239_v52 }
 0x429   : > { %1332 = vrot.lane.b32.xlu2 %v1323_v57, %s2378_s4 }
 0x42d   : > { %v1197_v60 = vpop.permute.xlu1 %1196  ;;  %v1216_v62 = vld [vmem:[#allocation3 + $0x20] sm:$0xff] }
 0x42e   : > { %1205 = vst.msk [vmem:[#allocation3 + $0x30] sm:$0xff] %vm740_vm3, %v1197_v60  ;;  %v1240_v15 = vmul.f32 %v1231_v12, %v1216_v62  ;;  %v1324_v6 = vmul.f32 %v2715_v61, %v1216_v62  ;;  %v1404_v7 = vmul.f32 %v2723_v4, %v1216_v62  ;;  %v1284_v11 = vmul.f32 %v2697_v31, %v1216_v62 }
 0x42f   : > { %v1444_v47 = vmul.f32 %v2699_v34, %v1216_v62  ;;  %v1524_v5 = vmul.f32 %v2717_v22, %v1216_v62  ;;  %v1364_v14 = vmul.f32 %v2687_v1, %v1216_v62  ;;  %v1564_v31 = vmul.f32 %v2743_v28, %v1216_v62 }
 0x430   : > { %1412 = vrot.lane.b32.xlu1 %v1403_v63, %s2379_s0  ;;  %1492 = vrot.lane.b32.xlu0 %v1483_v54, %s2380_s1  ;;  %v2781_v2 = vadd.f32 %v1255_v46, %v1240_v15  ;;  %v1484_v20 = vmul.f32 %v2733_v16, %v1216_v62 }
 0x431   : > { %1452 = vrot.lane.b32.xlu2 %v1443_v0, %s2381_s5 }
 0x435   : > { %v2795_v61 = vld [vmem:[#allocation3 + $0x30] sm:$0xff] }
 0x436   : > { %v1365_v4 = vmul.f32 %v2721_v3, %v2795_v61  ;;  %v1485_v1 = vmul.f32 %v2711_v56, %v2795_v61  ;;  %v1285_v34 = vmul.f32 %v2674_v10, %v2795_v61  ;;  %v1325_v22 = vmul.f32 %v2702_v45, %v2795_v61 }
 0x437   : > { %v1563_v3 = vmul.f32 %v2741_v27, %v1215_v51  ;;  %v1405_v16 = vmul.f32 %v2694_v24, %v2795_v61  ;;  %v1445_v56 = vmul.f32 %v2729_v9, %v2795_v61  ;;  %v1525_v10 = vmul.f32 %v2737_v18, %v2795_v61 }
 0x438   : > { %1334 = vrot.lane.b32.xlu1 %v1324_v6, %s2378_s4  ;;  %1414 = vrot.lane.b32.xlu0 %v1404_v7, %s2379_s0  ;;  %v1565_v45 = vmul.f32 %v2727_v8, %v2795_v61  ;;  %v1562_v24 = vmul.f32 %v2731_v13, %v2746_v32  ;;  %v1241_v6 = vmul.f32 %v2735_v17, %v2795_v61 }
 0x439   : > { %1294 = vrot.lane.b32.xlu2 %v1284_v11, %s2377_s27 }
 0x440   : > { %1454 = vrot.lane.b32.xlu1 %v1444_v47, %s2381_s5  ;;  %1534 = vrot.lane.b32.xlu0 %v1524_v5, %s2382_s6 }
 0x441   : > { %1374 = vrot.lane.b32.xlu2 %v1364_v14, %s2376_s30 }
 0x448   : > { %1574 = vrot.lane.b32.xlu1 %v1564_v31, %s2383_s25  ;;  %1376 = vrot.lane.b32.xlu0 %v1365_v4, %s2376_s30 }
 0x449   : > { %1494 = vrot.lane.b32.xlu2 %v1484_v20, %s2380_s1 }
 0x450   : > { %1496 = vrot.lane.b32.xlu0 %v1485_v1, %s2380_s1  ;;  %1296 = vrot.lane.b32.xlu1 %v1285_v34, %s2377_s27 }
 0x451   : > { %1336 = vrot.lane.b32.xlu2 %v1325_v22, %s2378_s4 }
 0x458   : > { %1572 = vrot.lane.b32.xlu0 %v1563_v3, %s2383_s25  ;;  %1416 = vrot.lane.b32.xlu1 %v1405_v16, %s2379_s0 }
 0x459   : > { %1456 = vrot.lane.b32.xlu2 %v1445_v56, %s2381_s5 }
 0x460   : > { %1536 = vrot.lane.b32.xlu1 %v1525_v10, %s2382_s6 }
 0x461   : > { %1576 = vrot.lane.b32.xlu2 %v1565_v45, %s2383_s25 }
 0x462   : > { %v1371_v9 = vpop.permute.xlu2 %1370 }
 0x468   : > { %1532 = vrot.lane.b32.xlu1 %v1523_v58, %s2382_s6  ;;  %s2167_s6 = sshll.u32 %s2989_s28, 4 }
 0x469   : > { %1570 = vrot.lane.b32.xlu2 %v1562_v24, %s2383_s25  ;;  %s683_s30 = scalar_lea.vmem %s2967_s22, %s2167_s6 }
 0x46a   : > { %v1491_v25 = vpop.permute.xlu2 %1490 }
 0x470   : > { %1610 = vrot.lane.b32.xlu1 %v2527_v19, %s2384_s23 }
 0x47a   : > { %v1291_v23 = vpop.permute.xlu0 %1290 }
 0x47b   : > { %v1302_v18 = vadd.f32 %v1291_v23, %v2755_v39  ;;  %v1331_v26 = vpop.permute.xlu1 %1330 }
 0x47d   : > { %v1342_v27 = vadd.f32 %v1331_v26, %v1302_v18 }
 0x47f   : > { %v1382_v8 = vadd.f32 %v1371_v9, %v1342_v27 }
 0x482   : > { %v1411_v28 = vpop.permute.xlu0 %1410 }
 0x483   : > { %v1422_v29 = vadd.f32 %v1411_v28, %v1382_v8  ;;  %v1333_v30 = vpop.permute.xlu2 %1332  ;;  %v1451_v33 = vpop.permute.xlu1 %1450 }
 0x485   : > { %v1462_v35 = vadd.f32 %v1451_v33, %v1422_v29 }
 0x487   : > { %v1502_v13 = vadd.f32 %v1491_v25, %v1462_v35 }
 0x48a   : > { %v1531_v37 = vpop.permute.xlu0 %1530 }
 0x48b   : > { %v1453_v32 = vpop.permute.xlu2 %1452  ;;  %v1542_v11 = vadd.f32 %v1531_v37, %v1502_v13 }
 0x493   : > { %v1295_v36 = vpop.permute.xlu2 %1294 }
 0x494   : > { %v1304_v49 = vadd.f32 %v1295_v36, %v2781_v2  ;;  %v1265_v2 = vadd.f32 %v2739_v21, %v1241_v6 }
 0x49a   : > { %v1293_v38 = vpop.permute.xlu1 %1292  ;;  %v1373_v41 = vpop.permute.xlu0 %1372 }
 0x49b   : > { %v1375_v40 = vpop.permute.xlu2 %1374  ;;  %v1303_v19 = vadd.f32 %v1293_v38, %v2772_v59 }
 0x49d   : > { %v1343_v42 = vadd.f32 %v1333_v30, %v1303_v19 }
 0x49f   : > { %v1383_v12 = vadd.f32 %v1373_v41, %v1343_v42 }
 0x4a2   : > { %v1413_v39 = vpop.permute.xlu1 %1412  ;;  %v1493_v48 = vpop.permute.xlu0 %1492 }
 0x4a3   : > { %v1495_v43 = vpop.permute.xlu2 %1494  ;;  %v1423_v44 = vadd.f32 %v1413_v39, %v1383_v12 }
 0x4a5   : > { %v1463_v46 = vadd.f32 %v1453_v32, %v1423_v44 }
 0x4a7   : > { %v1503_v28 = vadd.f32 %v1493_v48, %v1463_v46 }
 0x4aa   : > { %v1335_v50 = vpop.permute.xlu1 %1334  ;;  %v1415_v55 = vpop.permute.xlu0 %1414 }
 0x4ab   : > { %v1337_v51 = vpop.permute.xlu2 %1336  ;;  %v1344_v52 = vadd.f32 %v1335_v50, %v1304_v49 }
 0x4ad   : > { %v1384_v53 = vadd.f32 %v1375_v40, %v1344_v52 }
 0x4af   : > { %v1424_v57 = vadd.f32 %v1415_v55, %v1384_v53 }
 0x4b2   : > { %v1455_v58 = vpop.permute.xlu1 %1454  ;;  %v1535_v54 = vpop.permute.xlu0 %1534 }
 0x4b3   : > { %v1457_v60 = vpop.permute.xlu2 %1456  ;;  %v1464_v62 = vadd.f32 %v1455_v58, %v1424_v57 }
 0x4b5   : > { %v1504_v59 = vadd.f32 %v1495_v43, %v1464_v62 }
 0x4b7   : > { %v1544_v15 = vadd.f32 %v1535_v54, %v1504_v59 }
 0x4ba   : > { %v1575_v63 = vpop.permute.xlu1 %1574  ;;  %v1377_v1 = vpop.permute.xlu0 %1376 }
 0x4bb   : > { %v1577_v0 = vpop.permute.xlu2 %1576  ;;  %v1584_v7 = vadd.f32 %v1575_v63, %v1544_v15 }
 0x4bd   : > { %v1588_v47 = vsub.f32 0.0, %v1584_v7 }
 0x4bf   : > { %v1594_v34 = vmul.f32 1.442695, %v1588_v47 }
 0x4c1   : > { %2286 = vpow2.f32 %v1594_v34 }
 0x4c2   : > { %v1297_v5 = vpop.permute.xlu1 %1296  ;;  %v1497_v45 = vpop.permute.xlu0 %1496 }
 0x4c3   : > { %v1571_v14 = vpop.permute.xlu2 %1570  ;;  %v1305_v31 = vadd.f32 %v1297_v5, %v1265_v2 }
 0x4c4   : > { %v1582_v4 = vadd.f32 %v1571_v14, %v1542_v11 }
 0x4c5   : > { %v1345_v20 = vadd.f32 %v1337_v51, %v1305_v31  ;;  %v1650_v31 = vld [vmem:[%s2957_s12] sm:$0xf] }
 0x4c6   : > { %v1586_v22 = vsub.f32 0.0, %v1582_v4 }
 0x4c7   : > { %v1385_v16 = vadd.f32 %v1377_v1, %v1345_v20  ;;  %v2287_v61 = vpop.eup %2286 }
 0x4c8   : > { %v1590_v3 = vmul.f32 1.442695, %v1586_v22  ;;  %v1600_v23 = vadd.f32 1.0, %v2287_v61 }
 0x4ca   : > { %v1417_v56 = vpop.permute.xlu1 %1416  ;;  %2288 = vpow2.f32 %v1590_v3  ;;  %v1573_v33 = vpop.permute.xlu0 %1572 }
 0x4cb   : > { %v1425_v10 = vadd.f32 %v1417_v56, %v1385_v16  ;;  %2290 = vrcp.f32 %v1600_v23 }
 0x4cd   : > { %v1465_v17 = vadd.f32 %v1457_v60, %v1425_v10 }
 0x4cf   : > { %v1505_v24 = vadd.f32 %v1497_v45, %v1465_v17 }
 0x4d0   : > { %v2289_v21 = vpop.eup %2288 }
 0x4d1   : > { %v1598_v18 = vadd.f32 1.0, %v2289_v21  ;;  %v2291_v35 = vpop.eup %2290  ;;  %v2180_v21 = vld [vmem:[%s2959_s14] sm:$0xff] }
 0x4d2   : > { %v1537_v9 = vpop.permute.xlu1 %1536  ;;  %v2834_v38 = vmul.f32 %v2291_v35, %v1584_v7 }
 0x4d3   : > { %v1545_v25 = vadd.f32 %v1537_v9, %v1505_v24  ;;  %2292 = vrcp.f32 %v1598_v18  ;;  %v2181_v24 = vld [vmem:[%s2959_s14 + $0x8] sm:$0xff]  ;;  %v1682_v9 = vld [vmem:[%s2960_s15] sm:$0xff] }
 0x4d5   : > { %v1585_v26 = vadd.f32 %v1577_v0, %v1545_v25 }
 0x4d7   : > { %v1589_v27 = vsub.f32 0.0, %v1585_v26 }
 0x4d9   : > { %v1596_v8 = vmul.f32 1.442695, %v1589_v27  ;;  %v2293_v32 = vpop.eup %2292 }
 0x4da   : > { %v1533_v29 = vpop.permute.xlu1 %1532  ;;  %v2836_v40 = vmul.f32 %v2293_v32, %v1582_v4  ;;  %v1653_v4 = vld [vmem:[%s2958_s13] sm:$0xff] }
 0x4db   : > { %2294 = vpow2.f32 %v1596_v8  ;;  %v1543_v30 = vadd.f32 %v1533_v29, %v1503_v28  ;;  %v1683_v8 = vld [vmem:[%s2960_s15 + $0x8] sm:$0xff] }
 0x4dd   : > { %v1583_v13 = vadd.f32 %v1573_v33, %v1543_v30  ;;  %v1684_v33 = vld [vmem:[%s2960_s15 + $0x10] sm:$0xff] }
 0x4df   : > { %v1587_v36 = vsub.f32 0.0, %v1583_v13 }
 0x4e1   : > { %v2295_v37 = vpop.eup %2294  ;;  %v1592_v19 = vmul.f32 1.442695, %v1587_v36 }
 0x4e2   : > { %v1601_v41 = vadd.f32 1.0, %v2295_v37  ;;  %v1611_v42 = vpop.permute.xlu1 %1610 }
 0x4e3   : > { %2296 = vpow2.f32 %v1592_v19  ;;  %v1615_v12 = vmul.f32 %v1611_v42, %v2834_v38  ;;  %v1613_v39 = vmul.f32 %v1611_v42, %v2836_v40 }
 0x4e4   : > { %2298 = vrcp.f32 %v1601_v41 }
 0x4e5   : > { %1625 = vrot.lane.b32.xlu2 %v1615_v12, %s2987_s2  ;;  %1621 = vrot.lane.b32.xlu1 %v1613_v39, %s2987_s2 }
 0x4e9   : > { %v2297_v43 = vpop.eup %2296 }
 0x4ea   : > { %v2299_v44 = vpop.eup %2298  ;;  %v1599_v46 = vadd.f32 1.0, %v2297_v43 }
 0x4eb   : > { %v2842_v48 = vmul.f32 %v2299_v44, %v1585_v26  ;;  %v1772_v44 = vld [vmem:[%s2962_s17] sm:$0xff] }
 0x4ec   : > { %2300 = vrcp.f32 %v1599_v46 }
 0x4ed   : > { %v1616_v49 = vmul.f32 %v1611_v42, %v2842_v48 }
 0x4ef   : > { %1627 = vrot.lane.b32.xlu0 %v1616_v49, %s2987_s2 }
 0x4f2   : > { %v2301_v50 = vpop.eup %2300 }
 0x4f3   : > { %v2846_v51 = vmul.f32 %v2301_v50, %v1583_v13 }
 0x4f5   : > { %v1614_v52 = vmul.f32 %v1611_v42, %v2846_v51  ;;  %v1685_v42 = vld [vmem:[%s2960_s15 + $0x18] sm:$0xff] }
 0x4f7   : > { %1623 = vrot.lane.b32.xlu2 %v1614_v52, %s2987_s2 }
 0x53f   : > { %v1626_v53 = vpop.permute.xlu2 %1625 }
 0x540   : > { %v1640_v55 = vsel %vm1633_vm6, %v1626_v53, 0.0 }
 0x541   : > { %1641 = vadd.xlane.f32.xlu0 %v1640_v55  ;;  %v1822_v55 = vld [vmem:[%s2964_s19 + $0x18] sm:$0xff] }
 0x551   : > { %v1624_v60 = vpop.permute.xlu2 %1623 }
 0x552   : > { %v1637_v62 = vsel %vm1633_vm6, %v1624_v60, 0.0 }
 0x557   : > { %v1622_v57 = vpop.permute.xlu1 %1621 }
 0x558   : > { %v1634_v58 = vsel %vm1633_vm6, %v1622_v57, 0.0 }
 0x559   : > { %1635 = vadd.xlane.f32.xlu2 %v1634_v58 }
 0x561   : > { %v1628_v59 = vpop.permute.xlu0 %1627  ;;  %1638 = vadd.xlane.f32.xlu2 %v1637_v62 }
 0x562   : > { %v1643_v63 = vsel %vm1633_vm6, %v1628_v59, 0.0 }
 0x563   : > { %1644 = vadd.xlane.f32.xlu1 %v1643_v63 }
 0x5b4   : > { %v1642_v0 = vpop.xlane.xlu0 %1641 }
 0x5b5   : > { %v1648_v7 = vmul.f32 0.015625, %v1642_v0 }
 0x5cc   : > { %v1636_v54 = vpop.xlane.xlu2 %1635 }
 0x5cd   : > { %v1646_v5 = vmul.f32 0.015625, %v1636_v54 }
 0x5d4   : > { %v1639_v15 = vpop.xlane.xlu2 %1638 }
 0x5d5   : > { %v1647_v11 = vmul.f32 0.015625, %v1639_v15 }
 0x5d6   : > { %v1645_v6 = vpop.xlane.xlu1 %1644 }
 0x5d7   : > { %v1649_v2 = vmul.f32 0.015625, %v1645_v6  ;;  %v1651_v14 = vpack.c.bf16 %v1647_v11, %v1646_v5 }
 0x5d9   : > { %v1652_v47 = vpack.c.bf16 %v1649_v2, %v1648_v7 }
 0x5db   : > { %1664 = vmatpush.bf16.msra.mxu0 %v1652_v47 }
 0x5df   : > { %1665 = vmatpush.bf16.msra.mxu0 %v1651_v14  ;;  %v1773_v14 = vld [vmem:[%s2962_s17 + $0x8] sm:$0xff] }
 0x5e2   : > { %2133 = vmatmul.msk.bf16.vlgmr.msra.gmra.mxu0 %vm1654_vm7, %v1650_v31 }
 0x65f   : > { %v1667_v20 = vpop.f32.mrf.mxu0 }
 0x660   : > { %v1668_v1 = vadd.f32 %v1667_v20, %v1653_v4  ;;  %v2182_v4 = vld [vmem:[%s2961_s16] sm:$0xff] }
 0x662   : > { %v1671_v34 = vsub.f32 0.0, %v1668_v1 }
 0x664   : > { %v1672_v22 = vmul.f32 1.442695, %v1671_v34 }
 0x666   : > { %2302 = vpow2.f32 %v1672_v22 }
 0x667   : > { %v1669_v3 = vpop.f32.mrf.mxu0 }
 0x66c   : > { %v2303_v16 = vpop.eup %2302 }
 0x66d   : > { %v1674_v56 = vadd.f32 1.0, %v2303_v16 }
 0x66f   : > { %2304 = vrcp.f32 %v1674_v56 }
 0x675   : > { %v2305_v10 = vpop.eup %2304 }
 0x676   : > { %v1676_v17 = vmul.f32 %v2305_v10, %v1668_v1  ;;  %v2183_v10 = vld [vmem:[%s2963_s18] sm:$0xff] }
 0x678   : > { %v1681_v61 = vpack.c.bf16 %v1676_v17, %v1676_v17  ;;  %v2184_v17 = vld [vmem:[%s2963_s18 + $0x8] sm:$0xff] }
 0x67a   : > { %v1703_v45 = vsel %vm704_vm0, %v1681_v61, 0  ;;  %vm1990_vm0 = vcmask 1024  }
 0x67b   : > { %1712 = vmatpush.bf16.msrb.mxu1 %v1703_v45 }
 0x67e   : > { %2142 = vmatmul.msk.bf16.vlgmr.msrb.gmra.mxu1 %vm756_vm4, %v2180_v21 }
 0x68e   : > { %2143 = vmatmul.msk.bf16.gmra.mxu1 %vm756_vm4, %v2181_v24 }
 0x6fb   : > { %v1714_v23 = vpop.f32.mrf.mxu1 }
 0x6fc   : > { %v1715_v25 = vadd.f32 %v1714_v23, %v1682_v9 }
 0x6fe   : > { %v1724_v18 = vsub.f32 0.0, %v1715_v25 }
 0x700   : > { %v1728_v26 = vmul.f32 1.442695, %v1724_v18 }
 0x702   : > { %2306 = vpow2.f32 %v1728_v26 }
 0x703   : > { %v1716_v27 = vpop.f32.mrf.mxu1 }
 0x704   : > { %v1717_v30 = vadd.f32 %v1716_v27, %v1683_v8 }
 0x706   : > { %v1725_v32 = vsub.f32 0.0, %v1717_v30 }
 0x708   : > { %v2307_v28 = vpop.eup %2306  ;;  %v1730_v41 = vmul.f32 1.442695, %v1725_v32 }
 0x709   : > { %v1736_v29 = vadd.f32 1.0, %v2307_v28 }
 0x70b   : > { %2308 = vrcp.f32 %v1736_v29  ;;  %v1719_v35 = vpop.f32.mrf.mxu1 }
 0x70c   : > { %v1720_v13 = vadd.f32 %v1719_v35, %v1684_v33 }
 0x70e   : > { %v1726_v36 = vsub.f32 0.0, %v1720_v13 }
 0x710   : > { %v1732_v37 = vmul.f32 1.442695, %v1726_v36 }
 0x711   : > { %v2309_v19 = vpop.eup %2308 }
 0x712   : > { %2310 = vpow2.f32 %v1732_v37  ;;  %1746 = vperm.xlu2 %2255, %v2309_v19  }
 0x713   : > { %v1721_v12 = vpop.f32.mrf.mxu1  ;;  %2312 = vpow2.f32 %v1730_v41 }
 0x714   : > { %v1722_v39 = vadd.f32 %v1721_v12, %v1685_v42  ;;  %v2346_v42 = vld [vmem:[%s2983_s29] ss:$0 sm:$0xff] }
 0x716   : > { %v1727_v43 = vsub.f32 0.0, %v1722_v39 }
 0x718   : > { %v2311_v46 = vpop.eup %2310  ;;  %v1734_v49 = vmul.f32 1.442695, %v1727_v43 }
 0x719   : > { %v1738_v50 = vadd.f32 1.0, %v2311_v46  ;;  %v2313_v52 = vpop.eup %2312 }
 0x71a   : > { %2314 = vpow2.f32 %v1734_v49  ;;  %1776 = vperm.xlu2 %2255, %v1772_v44   ;;  %v1737_v53 = vadd.f32 1.0, %v2313_v52 }
 0x71b   : > { %2316 = vrcp.f32 %v1738_v50 }
 0x71c   : > { %2318 = vrcp.f32 %v1737_v53 }
 0x720   : > { %v2315_v57 = vpop.eup %2314 }
 0x721   : > { %v2317_v58 = vpop.eup %2316  ;;  %v1739_v60 = vadd.f32 1.0, %v2315_v57 }
 0x722   : > { %1756 = vperm.xlu0 %2256, %v2317_v58   ;;  %1840 = vperm.xlu2 %2255, %v1822_v55   ;;  %v2319_v62 = vpop.eup %2318 }
 0x723   : > { %2320 = vrcp.f32 %v1739_v60 }
 0x729   : > { %v2321_v59 = vpop.eup %2320 }
 0x72a   : > { %1761 = vperm.xlu1 %2254, %v2321_v59   ;;  %1751 = vperm.xlu0 %2256, %v2319_v62  }
 0x76c   : > { %v1747_v54 = vpop.permute.xlu2 %1746 }
 0x76d   : > { %v1764_v6 = vmul.f32 %v1747_v54, %v2836_v40  ;;  %v1821_v40 = vld [vmem:[%s2964_s19 + $0x10] sm:$0xff] }
 0x774   : > { %v1777_v1 = vpop.permute.xlu2 %1776 }
 0x77c   : > { %v1841_v37 = vpop.permute.xlu2 %1840 }
 0x794   : > { %v1757_v63 = vpop.permute.xlu0 %1756 }
 0x795   : > { %v1766_v7 = vmul.f32 %v1757_v63, %v2834_v38  ;;  %v1819_v38 = vld [vmem:[%s2964_s19] sm:$0xff] }
 0x79c   : > { %v1762_v0 = vpop.permute.xlu1 %1761  ;;  %v1752_v15 = vpop.permute.xlu0 %1751 }
 0x79d   : > { %v1767_v2 = vmul.f32 %v1762_v0, %v2842_v48  ;;  %v1765_v11 = vmul.f32 %v1752_v15, %v2846_v51  ;;  %v1820_v48 = vld [vmem:[%s2964_s19 + $0x8] sm:$0xff] }
 0x79f   : > { %v1771_v47 = vpack.c.bf16 %v1767_v2, %v1766_v7  ;;  %v1770_v5 = vpack.c.bf16 %v1765_v11, %v1764_v6 }
 0x7a1   : > { %1793 = vrot.lane.b32.xlu1 %v1771_v47, %s2987_s2  ;;  %1791 = vrot.lane.b32.xlu0 %v1770_v5, %s2987_s2 }
 0x7a9   : > { %1781 = vperm.xlu1 %2254, %v1773_v14   ;;  %1835 = vperm.xlu0 %2256, %v1821_v40  }
 0x7b1   : > { %1825 = vperm.xlu1 %2254, %v1819_v38   ;;  %1830 = vperm.xlu0 %2256, %v1820_v48  }
 0x813   : > { %v1794_v51 = vpop.permute.xlu1 %1793  ;;  %v1792_v31 = vpop.permute.xlu0 %1791 }
 0x814   : > { %1806 = vmatpush.bf16.msrb.mxu2 %v1794_v51 }
 0x818   : > { %1807 = vmatpush.bf16.msrb.mxu2 %v1792_v31 }
 0x81b   : > { %2148 = vmatmul.msk.bf16.vlgmr.msrb.gmra.mxu2 %vm1654_vm7, %v2182_v4  ;;  %v1782_v34 = vpop.permute.xlu1 %1781  ;;  %v1836_v61 = vpop.permute.xlu0 %1835  ;;  %v2161_v4 = vld [vmem:[%s2965_s20] sm:$0xf] }
 0x823   : > { %v1826_v45 = vpop.permute.xlu1 %1825  ;;  %v1831_v25 = vpop.permute.xlu0 %1830 }
 0x89e   : > { %v1809_v20 = vpop.f32.mrf.mxu2 }
 0x89f   : > { %v1810_v3 = vadd.f32 %v1809_v20, %v1777_v1  ;;  %v2185_v20 = vld [vmem:[%s2965_s20] sm:$0x10] }
 0x8a6   : > { %v1811_v22 = vpop.f32.mrf.mxu2 }
 0x8a7   : > { %v1812_v16 = vadd.f32 %v1811_v22, %v1782_v34  ;;  %v2162_v34 = vor.u32 %v2185_v20, %v2161_v4  ;;  %v1926_v22 = vld [vmem:[%s2966_s21] sm:$0xff] }
 0x8a9   : > { %v1818_v56 = vpack.c.bf16 %v1812_v16, %v1810_v3 }
 0x8ab   : > { %1866 = vmatpush.bf16.msrb.mxu0 %v1818_v56 }
 0x8ae   : > { %2157 = vmatmul.msk.bf16.vlgmr.msrb.gmra.mxu0 %vm1065_vm5, %v2183_v10 }
 0x8be   : > { %2158 = vmatmul.msk.bf16.gmra.mxu0 %vm1065_vm5, %v2184_v17  ;;  %v1927_v17 = vld [vmem:[%s2966_s21 + $0x8] sm:$0x3] }
 0x92b   : > { %v1868_v21 = vpop.f32.mrf.mxu0 }
 0x92c   : > { %v1869_v24 = vadd.f32 %v1868_v21, %v1826_v45 }
 0x92e   : > { %v1878_v9 = vsub.f32 0.0, %v1869_v24 }
 0x930   : > { %v1882_v23 = vmul.f32 1.442695, %v1878_v9 }
 0x932   : > { %2322 = vpow2.f32 %v1882_v23 }
 0x933   : > { %v1870_v18 = vpop.f32.mrf.mxu0 }
 0x934   : > { %v1871_v26 = vadd.f32 %v1870_v18, %v1831_v25 }
 0x936   : > { %v1879_v8 = vsub.f32 0.0, %v1871_v26 }
 0x938   : > { %v2323_v27 = vpop.eup %2322  ;;  %v1884_v30 = vmul.f32 1.442695, %v1879_v8 }
 0x939   : > { %v1890_v28 = vadd.f32 1.0, %v2323_v27 }
 0x93b   : > { %2324 = vrcp.f32 %v1890_v28  ;;  %v1873_v29 = vpop.f32.mrf.mxu0 }
 0x93c   : > { %v1874_v33 = vadd.f32 %v1873_v29, %v1836_v61  ;;  %2326 = vpow2.f32 %v1884_v30 }
 0x93e   : > { %v1880_v35 = vsub.f32 0.0, %v1874_v33 }
 0x940   : > { %v1886_v13 = vmul.f32 1.442695, %v1880_v35 }
 0x941   : > { %v2325_v32 = vpop.eup %2324 }
 0x942   : > { %v1898_v36 = vmul.f32 %v2325_v32, %v1869_v24  ;;  %2328 = vpow2.f32 %v1886_v13  ;;  %v2327_v39 = vpop.eup %2326 }
 0x943   : > { %v1875_v19 = vpop.f32.mrf.mxu0  ;;  %v1891_v50 = vadd.f32 1.0, %v2327_v39 }
 0x944   : > { %v1876_v41 = vadd.f32 %v1875_v19, %v1841_v37  ;;  %v1902_v12 = vmul.f32 %v2346_v42, %v1898_v36 }
 0x946   : > { %v1881_v43 = vsub.f32 0.0, %v1876_v41  ;;  %v1906_v44 = vsel %vm1633_vm6, %v1902_v12, 0.0 }
 0x947   : > { %1907 = vadd.xlane.f32.xlu0 %v1906_v44 }
 0x948   : > { %v2329_v46 = vpop.eup %2328  ;;  %v1888_v49 = vmul.f32 1.442695, %v1881_v43 }
 0x949   : > { %v1892_v52 = vadd.f32 1.0, %v2329_v46 }
 0x94a   : > { %2330 = vpow2.f32 %v1888_v49 }
 0x94b   : > { %2332 = vrcp.f32 %v1892_v52 }
 0x94c   : > { %2334 = vrcp.f32 %v1891_v50 }
 0x950   : > { %v2331_v53 = vpop.eup %2330 }
 0x951   : > { %v2333_v55 = vpop.eup %2332  ;;  %v1893_v57 = vadd.f32 1.0, %v2331_v53 }
 0x952   : > { %v1900_v58 = vmul.f32 %v2333_v55, %v1874_v33  ;;  %v2335_v60 = vpop.eup %2334 }
 0x953   : > { %2336 = vrcp.f32 %v1893_v57  ;;  %v1899_v59 = vmul.f32 %v2335_v60, %v1871_v26 }
 0x954   : > { %v1904_v62 = vmul.f32 %v2346_v42, %v1900_v58 }
 0x955   : > { %v1903_v15 = vmul.f32 %v2346_v42, %v1899_v59 }
 0x956   : > { %v1912_v63 = vsel %vm1633_vm6, %v1904_v62, 0.0 }
 0x957   : > { %1913 = vadd.xlane.f32.xlu2 %v1912_v63  ;;  %v1909_v7 = vsel %vm1633_vm6, %v1903_v15, 0.0 }
 0x959   : > { %v2337_v54 = vpop.eup %2336 }
 0x95a   : > { %v1901_v0 = vmul.f32 %v2337_v54, %v1876_v41 }
 0x95c   : > { %v1905_v6 = vmul.f32 %v2346_v42, %v1901_v0 }
 0x95e   : > { %v1915_v2 = vsel %vm1633_vm6, %v1905_v6, 0.0 }
 0x95f   : > { %1910 = vadd.xlane.f32.xlu2 %v1909_v7  ;;  %1916 = vadd.xlane.f32.xlu1 %v1915_v2 }
 0x9ba   : > { %v1908_v38 = vpop.xlane.xlu0 %1907 }
 0x9bb   : > { %v1918_v31 = vmul.f32 0.015625, %v1908_v38 }
 0x9ca   : > { %v1914_v11 = vpop.xlane.xlu2 %1913 }
 0x9cb   : > { %v1920_v14 = vmul.f32 0.015625, %v1914_v11 }
 0x9d2   : > { %v1917_v47 = vpop.xlane.xlu1 %1916  ;;  %v1911_v5 = vpop.xlane.xlu2 %1910 }
 0x9d3   : > { %v1921_v40 = vmul.f32 0.015625, %v1917_v47  ;;  %v1919_v51 = vmul.f32 0.015625, %v1911_v5 }
 0x9d5   : > { %v1925_v48 = vpack.c.bf16 %v1921_v40, %v1920_v14  ;;  %v1924_v1 = vpack.c.bf16 %v1919_v51, %v1918_v31 }
 0x9d7   : > { %1942 = vmatpush.bf16.msra.mxu2 %v1925_v48 }
 0x9db   : > { %1943 = vmatpush.bf16.msra.mxu2 %v1924_v1 }
 0x9de   : > { %2163 = vmatmul.msk.bf16.vlgmr.msra.gmra.mxu2 %vm1654_vm7, %v2162_v34 }
 0xa61   : > { %v1945_v3 = vpop.f32.mrf.mxu2 }
 0xa62   : > { %v1946_v16 = vadd.f32 %v1945_v3, %v1926_v22 }
 0xa64   : > { %v1950_v56 = vsub.f32 0.0, %v1946_v16 }
 0xa66   : > { %v1952_v10 = vmul.f32 1.442695, %v1950_v56 }
 0xa68   : > { %2338 = vpow2.f32 %v1952_v10 }
 0xa69   : > { %v1947_v61 = vpop.f32.mrf.mxu2 }
 0xa6a   : > { %v1948_v45 = vadd.f32 %v1947_v61, %v1927_v17 }
 0xa6c   : > { %v1951_v21 = vsub.f32 0.0, %v1948_v45 }
 0xa6e   : > { %v2339_v24 = vpop.eup %2338  ;;  %v1954_v9 = vmul.f32 1.442695, %v1951_v21 }
 0xa6f   : > { %v1956_v23 = vadd.f32 1.0, %v2339_v24 }
 0xa70   : > { %2340 = vpow2.f32 %v1954_v9 }
 0xa71   : > { %2342 = vrcp.f32 %v1956_v23  ;;  %v1969_v28 = vand.u32 2147483648, %v1956_v23  ;;  %v1967_v30 = vand.u32 2147483647, %v1956_v23  ;;  %vm1963_vm9 = vweird.f32 %v1956_v23 }
 0xa73   : > { %v1970_v13 = vor.u32 1.1754944e-38, %v1969_v28  ;;  %vm1968_vm12 = vcmp.eq.f32.partialorder %v1967_v30, 8.507059e+37 }
 0xa76   : > { %v2341_v25 = vpop.eup %2340 }
 0xa77   : > { %v2343_v18 = vpop.eup %2342  ;;  %v1957_v26 = vadd.f32 1.0, %v2341_v25 }
 0xa78   : > { %v1959_v27 = vmul.f32 %v2343_v18, %v1956_v23  ;;  %vm1964_vm8 = vweird.f32 %v2343_v18 }
 0xa79   : > { %2344 = vrcp.f32 %v1957_v26  ;;  %vm1965_vm10 = vmor %vm1963_vm9, %vm1964_vm8  ;;  %v1984_v41 = vand.u32 2147483648, %v1957_v26  ;;  %v1982_v12 = vand.u32 2147483647, %v1957_v26  ;;  %vm1978_vm14 = vweird.f32 %v1957_v26 }
 0xa7a   : > { %v1960_v8 = vsub.f32 1.0, %v1959_v27 }
 0xa7b   : > { %v1985_v43 = vor.u32 1.1754944e-38, %v1984_v41  ;;  %vm1983_vm1 = vcmp.eq.f32.partialorder %v1982_v12, 8.507059e+37 }
 0xa7c   : > { %v1961_v29 = vmul.f32 %v2343_v18, %v1960_v8 }
 0xa7e   : > { %v1962_v33 = vadd.f32 %v2343_v18, %v1961_v29 }
 0xa7f   : > { %v2345_v35 = vpop.eup %2344 }
 0xa80   : > { %v1966_v32 = vsel %vm1965_vm10, %v2343_v18, %v1962_v33  ;;  %v1974_v36 = vmul.f32 %v2345_v35, %v1957_v26  ;;  %vm1979_vm13 = vweird.f32 %v2345_v35 }
 0xa81   : > { %v1971_v37 = vsel %vm1968_vm12, %v1970_v13, %v1966_v32  ;;  %vm1980_vm15 = vmor %vm1978_vm14, %vm1979_vm13 }
 0xa82   : > { %1989 = vst.msk [vmem:[%s683_s30] sm:$0xff] %vm1988_vm11, %v1971_v37  ;;  %v1975_v19 = vsub.f32 1.0, %v1974_v36 }
 0xa84   : > { %v1976_v42 = vmul.f32 %v2345_v35, %v1975_v19 }
 0xa86   : > { %v1977_v39 = vadd.f32 %v2345_v35, %v1976_v42 }
 0xa88   : > { %v1981_v44 = vsel %vm1980_vm15, %v2345_v35, %v1977_v39 }
 0xa89   : > { %v1986_v46 = vsel %vm1983_vm1, %v1985_v43, %v1981_v44 }
 0xa8a   : > { %1991 = vst.msk [vmem:[%s683_s30 + $0x8] sm:$0x3] %vm1990_vm0, %v1986_v46 }
 0xa8b PF: > { %s32_s3 = sadd.s32 1, %s2353_s3  }
 0xa8c   : > { %p29_p4 = scmp.ge.s32.totalorder %s32_s3, 4  }
 0xa8e   :  { %31 = sbr.rel (!%p29_p4) target bundleno = 8 (0x8), region = 146 }

</bundles_post_ra>
